<compile_context>
chip_gen: v7x
topology: tpu7x:2x2x1
jax: 0.10.0
libtpu: 0.0.40
codegen_flags: <defaults>
</compile_context>

<pallas_src>
import numpy as np
import jax
import jax.numpy as jnp
from jax import lax
from jax.experimental import pallas as pl
from jax.experimental.pallas import tpu as pltpu

CIN = 3
COUT = 8
BN_EPS = 1e-5
MIN_V = -0.9
MAX_V = 0.9


def _fused_kernel(ws_ref, sh_ref, gb_ref, x_ref, e_ref, d_ref, o_ref):
    """Fused conv-transpose(1x1,s=2) + BN(affine folded) + ReLU6 + maxpool(2,1,1) + clamp + tanh.

    Works on a TH-row x full-width tile of one image and writes the matching
    (2*TH x 2*W) tile of the final NCHW output directly.

      ws_ref : (COUT, CIN) SMEM   conv weight columns with BN scale folded in
      sh_ref : (COUT,)     SMEM   BN shift with the conv bias folded in
      gb_ref : (COUT,)     SMEM   relu6(bn(conv_bias)) = value of every "bias-only" pixel
      x_ref  : (1, CIN, TH, W)    input row tile
      e_ref  : (2*TH, TH)         0/1 row-duplication matrix: (E @ g)[p, :] = g[p // 2, :]
      d_ref  : (W, 2*W)           0/1 col-duplication matrix: (g @ D)[:, q] = g[:, q // 2]
      o_ref  : (1, COUT, 2*TH, 2*W) output tile
    """
    _, _, th2, w2 = o_ref.shape

    x0 = x_ref[0, 0, :, :]
    x1 = x_ref[0, 1, :, :]
    x2 = x_ref[0, 2, :, :]
    em = e_ref[...]
    dm = d_ref[...]

    # The four global corners of the pooled output see only the conv "data" pixel.
    # Rows are tiled: output row 0 lives in the first tile, row 2H-1 in the last tile;
    # columns are never tiled, so cols 0 and 2W-1 are local cols 0 and w2-1.
    first = pl.program_id(1) == 0
    last = pl.program_id(1) == pl.num_programs(1) - 1
    ri = lax.broadcasted_iota(jnp.int32, (th2, w2), 0)
    ci = lax.broadcasted_iota(jnp.int32, (th2, w2), 1)
    corner = (((ri == 0) & first) | ((ri == th2 - 1) & last)) & ((ci == 0) | (ci == w2 - 1))

    for c in range(COUT):
        # 1x1 transposed-conv "data" pixels with the BN affine folded in, then ReLU6
        # (exact f32 VPU FMAs from SMEM scalars; the K=3 contraction does not need the MXU).
        g = jnp.clip(
            x0 * ws_ref[c, 0] + x1 * ws_ref[c, 1] + x2 * ws_ref[c, 2] + sh_ref[c],
            0.0, 6.0)
        # 2x nearest-neighbour upsample of the data pixels via constant 0/1 matrices on the
        # MXU (each output element picks exactly one g value; HIGHEST keeps it f32-accurate).
        up = jnp.dot(
            em,
            jnp.dot(g, dm, preferred_element_type=jnp.float32,
                    precision=lax.Precision.HIGHEST),
            preferred_element_type=jnp.float32,
            precision=lax.Precision.HIGHEST)
        # MaxPool(2, stride=1, pad=1): every pooled pixel sees its one data pixel and,
        # except at the four global corners, at least one bias-only pixel of value gb.
        # g and gb are >= 0 (post-ReLU6), so -1.0 acts as "no bias-only neighbour".
        other = jnp.where(corner, -1.0, gb_ref[c])
        pooled = jnp.maximum(up, other)
        o_ref[0, c, :, :] = jnp.tanh(jnp.clip(pooled, MIN_V, MAX_V))


def model_forward(x, weight, bias, gamma, beta):
    """x: (N, 3, H, W) f32 NCHW. Returns (N, 8, 2H, 2W) f32 NCHW."""
    N, Cin, H, W = x.shape
    assert Cin == CIN
    Ho, Wo = 2 * H - 1, 2 * W - 1            # ConvTranspose2d output spatial size
    n_total = jnp.float32(N * Ho * Wo)

    # --- Train-mode BatchNorm batch statistics, computed analytically from x moments ---------
    # The transposed-conv output equals (w_c . x + b_c) at even coordinates and b_c elsewhere,
    # so with z = output - b (per channel): sum(z) = w_c . S, sum(z^2) = w_c^T G w_c, rest 0.
    S = jnp.sum(x, axis=(0, 2, 3))                                          # (CIN,)
    G = jnp.einsum("nihw,njhw->ij", x, x, precision=lax.Precision.HIGHEST)  # (CIN, CIN)
    wz_sum = jnp.sum(weight * S[:, None], axis=0)                           # (COUT,)
    Gw = jnp.sum(G[:, :, None] * weight[None, :, :], axis=1)                # (CIN, COUT)
    wz_sq = jnp.sum(weight * Gw, axis=0)                                    # (COUT,)
    mean_z = wz_sum / n_total
    var = wz_sq / n_total - mean_z * mean_z          # biased variance (train-mode BN forward)
    scale = gamma * lax.rsqrt(var + BN_EPS)
    shift = beta - (bias + mean_z) * scale
    # TODO(synk): BatchNorm running-stat buffer updates (training state) are not modeled; only
    #             the forward output (which uses batch statistics) is reproduced.

    ws = (weight * scale[None, :]).T                 # (COUT, CIN): BN scale folded into weights
    sh = bias * scale + shift                        # (COUT,): conv bias folded into BN shift
    gb = jnp.clip(sh, 0.0, 6.0)                      # relu6(bn(bias-only pixel value))

    # --- Row-tile size: sublane-aligned divisor of H (falls back to the full H) --------------
    TH = H
    for cand in (64, 56, 40, 32, 24, 16, 8):
        if H % cand == 0 and H // cand >= 2:
            TH = cand
            break
    NH = H // TH

    # Constant 0/1 duplication matrices for the in-kernel 2x upsample (fed to the MXU).
    E = (jnp.arange(2 * TH)[:, None] // 2 == jnp.arange(TH)[None, :]).astype(jnp.float32)
    D = (jnp.arange(W)[:, None] == jnp.arange(2 * W)[None, :] // 2).astype(jnp.float32)

    out = pl.pallas_call(
        _fused_kernel,
        out_shape=jax.ShapeDtypeStruct((N, COUT, 2 * H, 2 * W), jnp.float32),
        grid=(N, NH),
        in_specs=[
            pl.BlockSpec(memory_space=pltpu.MemorySpace.SMEM),          # ws (COUT, CIN)
            pl.BlockSpec(memory_space=pltpu.MemorySpace.SMEM),          # sh (COUT,)
            pl.BlockSpec(memory_space=pltpu.MemorySpace.SMEM),          # gb (COUT,)
            pl.BlockSpec((1, CIN, TH, W), lambda n, t: (n, 0, t, 0)),   # x row tile
            pl.BlockSpec((2 * TH, TH), lambda n, t: (0, 0)),            # E (constant)
            pl.BlockSpec((W, 2 * W), lambda n, t: (0, 0)),              # D (constant)
        ],
        out_specs=pl.BlockSpec((1, COUT, 2 * TH, 2 * W), lambda n, t: (n, 0, t, 0)),
        compiler_params=pltpu.CompilerParams(
            dimension_semantics=("parallel", "parallel")),
    )(ws, sh, gb, x, E, D)
    return out


def reference_forward(x, weight, bias, gamma, beta):
    """Pure-JAX reference following the PyTorch ops literally."""
    N, _, H, W = x.shape
    Ho, Wo = 2 * H - 1, 2 * W - 1
    y = jnp.einsum("nchw,cd->ndhw", x, weight, precision=lax.Precision.HIGHEST)
    y = y + bias[None, :, None, None]
    v1 = jnp.broadcast_to(bias[None, :, None, None], (N, COUT, Ho, Wo))
    v1 = v1.at[:, :, ::2, ::2].set(y)                       # ConvTranspose2d(k=1, stride=2)
    mean = v1.mean(axis=(0, 2, 3))
    var = v1.var(axis=(0, 2, 3))                            # biased (train-mode BN)
    v2 = (v1 - mean[None, :, None, None]) * lax.rsqrt(var + BN_EPS)[None, :, None, None]
    v2 = v2 * gamma[None, :, None, None] + beta[None, :, None, None]
    v5 = jnp.clip(v2, 0.0, 6.0)                             # ReLU6
    v8 = lax.reduce_window(
        v5, -jnp.inf, lax.max,
        window_dimensions=(1, 1, 2, 2),
        window_strides=(1, 1, 1, 1),
        padding=((0, 0), (0, 0), (1, 1), (1, 1)),
    )                                                       # MaxPool2d(2, stride=1, padding=1)
    return jnp.tanh(jnp.clip(v8, MIN_V, MAX_V))


if __name__ == "__main__":
    key = jax.random.PRNGKey(0)
    kx, kw, kb, kg, kbe, kx2 = jax.random.split(key, 6)

    # Small shapes consistent with the module (Cin=3 fixed by the conv).
    N, H, W = 2, 16, 16
    x = jax.random.normal(kx, (N, CIN, H, W), dtype=jnp.float32)

    # Deterministic parameter init (ConvTranspose2d weight (Cin, Cout), bias (Cout,); BN affine).
    weight = jax.random.normal(kw, (CIN, COUT), dtype=jnp.float32) * 0.5
    bias = jax.random.normal(kb, (COUT,), dtype=jnp.float32) * 0.1
    gamma = 1.0 + 0.2 * jax.random.normal(kg, (COUT,), dtype=jnp.float32)
    beta = 0.1 * jax.random.normal(kbe, (COUT,), dtype=jnp.float32)

    fwd = jax.jit(model_forward)
    out = jax.block_until_ready(fwd(x, weight, bias, gamma, beta))
    assert out.shape == (N, COUT, 2 * H, 2 * W), out.shape
    ref = reference_forward(x, weight, bias, gamma, beta)
    np.testing.assert_allclose(np.asarray(out), np.asarray(ref), rtol=2e-4, atol=1e-4)

    # Second shape: exercises multi-tile rows (NH > 2) and the corner logic across tiles.
    N2, H2, W2 = 1, 24, 24
    x2 = jax.random.normal(kx2, (N2, CIN, H2, W2), dtype=jnp.float32)
    out2 = jax.block_until_ready(fwd(x2, weight, bias, gamma, beta))
    ref2 = reference_forward(x2, weight, bias, gamma, beta)
    np.testing.assert_allclose(np.asarray(out2), np.asarray(ref2), rtol=2e-4, atol=1e-4)

    print("KERNEL_OK")
</pallas_src>

<mosaic_0001>
module attributes {stable_mosaic.version = 11 : i64} {
  func.func @_fused_kernel(%arg0: i32, %arg1: i32, %arg2: memref<8x3xf32, #tpu.memory_space<smem>>, %arg3: memref<8xf32, #tpu.memory_space<smem>>, %arg4: memref<8xf32, #tpu.memory_space<smem>>, %arg5: memref<1x3x8x16xf32, #tpu.memory_space<vmem>>, %arg6: memref<16x8xf32, #tpu.memory_space<vmem>>, %arg7: memref<16x32xf32, #tpu.memory_space<vmem>>, %arg8: memref<1x8x16x32xf32, #tpu.memory_space<vmem>>) attributes {dimension_semantics = [#tpu.dimension_semantics<parallel>, #tpu.dimension_semantics<parallel>], iteration_bounds = array<i64: 2, 2>, scalar_prefetch = 0 : i64, scratch_operands = 0 : i64, tpu.core_type = #tpu.core_type<tc>, window_params = [{transform_indices = @transform_0, window_bounds = array<i64: 8, 3>}, {transform_indices = @transform_1, window_bounds = array<i64: 8>}, {transform_indices = @transform_2, window_bounds = array<i64: 8>}, {transform_indices = @transform_3, window_bounds = array<i64: 1, 3, 8, 16>}, {pipeline_mode = #tpu.pipeline_mode<synchronous>, transform_indices = @transform_4, window_bounds = array<i64: 16, 8>}, {pipeline_mode = #tpu.pipeline_mode<synchronous>, transform_indices = @transform_5, window_bounds = array<i64: 16, 32>}, {transform_indices = @transform_6, window_bounds = array<i64: 1, 8, 16, 32>}]} {
    %c0 = arith.constant 0 : index
    %c0_0 = arith.constant 0 : index
    %c0_1 = arith.constant 0 : index
    %c0_2 = arith.constant 0 : index
    %0 = vector.load %arg5[%c0, %c0_0, %c0_1, %c0_2] : memref<1x3x8x16xf32, #tpu.memory_space<vmem>>, vector<1x1x8x16xf32>
    %1 = vector.shape_cast %0 : vector<1x1x8x16xf32> to vector<8x16xf32>
    %c0_3 = arith.constant 0 : index
    %c1 = arith.constant 1 : index
    %c0_4 = arith.constant 0 : index
    %c0_5 = arith.constant 0 : index
    %2 = vector.load %arg5[%c0_3, %c1, %c0_4, %c0_5] : memref<1x3x8x16xf32, #tpu.memory_space<vmem>>, vector<1x1x8x16xf32>
    %3 = vector.shape_cast %2 : vector<1x1x8x16xf32> to vector<8x16xf32>
    %c0_6 = arith.constant 0 : index
    %c2 = arith.constant 2 : index
    %c0_7 = arith.constant 0 : index
    %c0_8 = arith.constant 0 : index
    %4 = vector.load %arg5[%c0_6, %c2, %c0_7, %c0_8] : memref<1x3x8x16xf32, #tpu.memory_space<vmem>>, vector<1x1x8x16xf32>
    %5 = vector.shape_cast %4 : vector<1x1x8x16xf32> to vector<8x16xf32>
    %c0_9 = arith.constant 0 : index
    %c0_10 = arith.constant 0 : index
    %6 = vector.load %arg6[%c0_9, %c0_10] : memref<16x8xf32, #tpu.memory_space<vmem>>, vector<16x8xf32>
    %c0_11 = arith.constant 0 : index
    %c0_12 = arith.constant 0 : index
    %7 = vector.load %arg7[%c0_11, %c0_12] : memref<16x32xf32, #tpu.memory_space<vmem>>, vector<16x32xf32>
    %c0_i32 = arith.constant 0 : i32
    %8 = arith.cmpi eq, %arg1, %c0_i32 : i32
    %c1_i32 = arith.constant 1 : i32
    %9 = arith.cmpi eq, %arg1, %c1_i32 : i32
    %10 = tpu.iota {dimensions = array<i32: 0>} : vector<16x32xi32>
    %11 = tpu.iota {dimensions = array<i32: 1>} : vector<16x32xi32>
    %c0_i32_13 = arith.constant 0 : i32
    %12 = vector.broadcast %c0_i32_13 : i32 to vector<16x32xi32>
    %13 = arith.cmpi eq, %10, %12 : vector<16x32xi32>
    %14 = vector.broadcast %8 : i1 to vector<16x32xi1>
    %15 = arith.andi %13, %14 : vector<16x32xi1>
    %c15_i32 = arith.constant 15 : i32
    %16 = vector.broadcast %c15_i32 : i32 to vector<16x32xi32>
    %17 = arith.cmpi eq, %10, %16 : vector<16x32xi32>
    %18 = vector.broadcast %9 : i1 to vector<16x32xi1>
    %19 = arith.andi %17, %18 : vector<16x32xi1>
    %20 = arith.ori %15, %19 : vector<16x32xi1>
    %c0_i32_14 = arith.constant 0 : i32
    %21 = vector.broadcast %c0_i32_14 : i32 to vector<16x32xi32>
    %22 = arith.cmpi eq, %11, %21 : vector<16x32xi32>
    %c31_i32 = arith.constant 31 : i32
    %23 = vector.broadcast %c31_i32 : i32 to vector<16x32xi32>
    %24 = arith.cmpi eq, %11, %23 : vector<16x32xi32>
    %25 = arith.ori %22, %24 : vector<16x32xi1>
    %26 = arith.andi %20, %25 : vector<16x32xi1>
    %c0_15 = arith.constant 0 : index
    %c0_16 = arith.constant 0 : index
    %27 = memref.load %arg2[%c0_15, %c0_16] : memref<8x3xf32, #tpu.memory_space<smem>>
    %28 = vector.broadcast %27 : f32 to vector<8x16xf32>
    %29 = arith.mulf %1, %28 : vector<8x16xf32>
    %c0_17 = arith.constant 0 : index
    %c1_18 = arith.constant 1 : index
    %30 = memref.load %arg2[%c0_17, %c1_18] : memref<8x3xf32, #tpu.memory_space<smem>>
    %31 = vector.broadcast %30 : f32 to vector<8x16xf32>
    %32 = arith.mulf %3, %31 : vector<8x16xf32>
    %33 = arith.addf %29, %32 : vector<8x16xf32>
    %c0_19 = arith.constant 0 : index
    %c2_20 = arith.constant 2 : index
    %34 = memref.load %arg2[%c0_19, %c2_20] : memref<8x3xf32, #tpu.memory_space<smem>>
    %35 = vector.broadcast %34 : f32 to vector<8x16xf32>
    %36 = arith.mulf %5, %35 : vector<8x16xf32>
    %37 = arith.addf %33, %36 : vector<8x16xf32>
    %c0_21 = arith.constant 0 : index
    %38 = memref.load %arg3[%c0_21] : memref<8xf32, #tpu.memory_space<smem>>
    %39 = vector.broadcast %38 : f32 to vector<8x16xf32>
    %40 = arith.addf %37, %39 : vector<8x16xf32>
    %cst = arith.constant 0.000000e+00 : f32
    %cst_22 = arith.constant 6.000000e+00 : f32
    %41 = vector.broadcast %cst : f32 to vector<8x16xf32>
    %42 = arith.maximumf %41, %40 : vector<8x16xf32>
    %43 = vector.broadcast %cst_22 : f32 to vector<8x16xf32>
    %44 = arith.minimumf %43, %42 : vector<8x16xf32>
    %cst_23 = arith.constant dense<0.000000e+00> : vector<8x32xf32>
    %45 = tpu.matmul %44, %7, %cst_23 {dimension_numbers = #tpu.dot_dimension_numbers<[1], [0], [0], [1], [0, 0, 1, 1], [], []>, precision = #tpu.contract_precision<fp32>} : vector<8x16xf32>, vector<16x32xf32>, vector<8x32xf32> -> vector<8x32xf32>
    %cst_24 = arith.constant dense<0.000000e+00> : vector<16x32xf32>
    %46 = tpu.matmul %6, %45, %cst_24 {dimension_numbers = #tpu.dot_dimension_numbers<[1], [0], [0], [1], [0, 0, 1, 1], [], []>, precision = #tpu.contract_precision<fp32>} : vector<16x8xf32>, vector<8x32xf32>, vector<16x32xf32> -> vector<16x32xf32>
    %c0_25 = arith.constant 0 : index
    %47 = memref.load %arg4[%c0_25] : memref<8xf32, #tpu.memory_space<smem>>
    %cst_26 = arith.constant -1.000000e+00 : f32
    %48 = vector.broadcast %cst_26 : f32 to vector<16x32xf32>
    %49 = vector.broadcast %47 : f32 to vector<16x32xf32>
    %50 = arith.select %26, %48, %49 : vector<16x32xi1>, vector<16x32xf32>
    %51 = arith.maximumf %46, %50 : vector<16x32xf32>
    %cst_27 = arith.constant -0.899999976 : f32
    %cst_28 = arith.constant 0.899999976 : f32
    %52 = vector.broadcast %cst_27 : f32 to vector<16x32xf32>
    %53 = arith.maximumf %52, %51 : vector<16x32xf32>
    %54 = vector.broadcast %cst_28 : f32 to vector<16x32xf32>
    %55 = arith.minimumf %54, %53 : vector<16x32xf32>
    %56 = math.tanh %55 : vector<16x32xf32>
    %c0_29 = arith.constant 0 : index
    %c0_30 = arith.constant 0 : index
    %c0_31 = arith.constant 0 : index
    %c0_32 = arith.constant 0 : index
    %57 = vector.load %arg8[%c0_29, %c0_30, %c0_31, %c0_32] : memref<1x8x16x32xf32, #tpu.memory_space<vmem>>, vector<1x1x16x32xf32>
    %58 = vector.shape_cast %57 : vector<1x1x16x32xf32> to vector<16x32xf32>
    %59 = vector.shape_cast %56 : vector<16x32xf32> to vector<1x1x16x32xf32>
    tpu.vector_store %arg8[%c0_29, %c0_30, %c0_31, %c0_32], %59 {strides = array<i32>} : memref<1x8x16x32xf32, #tpu.memory_space<vmem>>, vector<1x1x16x32xf32>,
    %c1_33 = arith.constant 1 : index
    %c0_34 = arith.constant 0 : index
    %60 = memref.load %arg2[%c1_33, %c0_34] : memref<8x3xf32, #tpu.memory_space<smem>>
    %61 = vector.broadcast %60 : f32 to vector<8x16xf32>
    %62 = arith.mulf %1, %61 : vector<8x16xf32>
    %c1_35 = arith.constant 1 : index
    %c1_36 = arith.constant 1 : index
    %63 = memref.load %arg2[%c1_35, %c1_36] : memref<8x3xf32, #tpu.memory_space<smem>>
    %64 = vector.broadcast %63 : f32 to vector<8x16xf32>
    %65 = arith.mulf %3, %64 : vector<8x16xf32>
    %66 = arith.addf %62, %65 : vector<8x16xf32>
    %c1_37 = arith.constant 1 : index
    %c2_38 = arith.constant 2 : index
    %67 = memref.load %arg2[%c1_37, %c2_38] : memref<8x3xf32, #tpu.memory_space<smem>>
    %68 = vector.broadcast %67 : f32 to vector<8x16xf32>
    %69 = arith.mulf %5, %68 : vector<8x16xf32>
    %70 = arith.addf %66, %69 : vector<8x16xf32>
    %c1_39 = arith.constant 1 : index
    %71 = memref.load %arg3[%c1_39] : memref<8xf32, #tpu.memory_space<smem>>
    %72 = vector.broadcast %71 : f32 to vector<8x16xf32>
    %73 = arith.addf %70, %72 : vector<8x16xf32>
    %cst_40 = arith.constant 0.000000e+00 : f32
    %cst_41 = arith.constant 6.000000e+00 : f32
    %74 = vector.broadcast %cst_40 : f32 to vector<8x16xf32>
    %75 = arith.maximumf %74, %73 : vector<8x16xf32>
    %76 = vector.broadcast %cst_41 : f32 to vector<8x16xf32>
    %77 = arith.minimumf %76, %75 : vector<8x16xf32>
    %cst_42 = arith.constant dense<0.000000e+00> : vector<8x32xf32>
    %78 = tpu.matmul %77, %7, %cst_42 {dimension_numbers = #tpu.dot_dimension_numbers<[1], [0], [0], [1], [0, 0, 1, 1], [], []>, precision = #tpu.contract_precision<fp32>} : vector<8x16xf32>, vector<16x32xf32>, vector<8x32xf32> -> vector<8x32xf32>
    %cst_43 = arith.constant dense<0.000000e+00> : vector<16x32xf32>
    %79 = tpu.matmul %6, %78, %cst_43 {dimension_numbers = #tpu.dot_dimension_numbers<[1], [0], [0], [1], [0, 0, 1, 1], [], []>, precision = #tpu.contract_precision<fp32>} : vector<16x8xf32>, vector<8x32xf32>, vector<16x32xf32> -> vector<16x32xf32>
    %c1_44 = arith.constant 1 : index
    %80 = memref.load %arg4[%c1_44] : memref<8xf32, #tpu.memory_space<smem>>
    %cst_45 = arith.constant -1.000000e+00 : f32
    %81 = vector.broadcast %cst_45 : f32 to vector<16x32xf32>
    %82 = vector.broadcast %80 : f32 to vector<16x32xf32>
    %83 = arith.select %26, %81, %82 : vector<16x32xi1>, vector<16x32xf32>
    %84 = arith.maximumf %79, %83 : vector<16x32xf32>
    %cst_46 = arith.constant -0.899999976 : f32
    %cst_47 = arith.constant 0.899999976 : f32
    %85 = vector.broadcast %cst_46 : f32 to vector<16x32xf32>
    %86 = arith.maximumf %85, %84 : vector<16x32xf32>
    %87 = vector.broadcast %cst_47 : f32 to vector<16x32xf32>
    %88 = arith.minimumf %87, %86 : vector<16x32xf32>
    %89 = math.tanh %88 : vector<16x32xf32>
    %c0_48 = arith.constant 0 : index
    %c1_49 = arith.constant 1 : index
    %c0_50 = arith.constant 0 : index
    %c0_51 = arith.constant 0 : index
    %90 = vector.load %arg8[%c0_48, %c1_49, %c0_50, %c0_51] : memref<1x8x16x32xf32, #tpu.memory_space<vmem>>, vector<1x1x16x32xf32>
    %91 = vector.shape_cast %90 : vector<1x1x16x32xf32> to vector<16x32xf32>
    %92 = vector.shape_cast %89 : vector<16x32xf32> to vector<1x1x16x32xf32>
    tpu.vector_store %arg8[%c0_48, %c1_49, %c0_50, %c0_51], %92 {strides = array<i32>} : memref<1x8x16x32xf32, #tpu.memory_space<vmem>>, vector<1x1x16x32xf32>,
    %c2_52 = arith.constant 2 : index
    %c0_53 = arith.constant 0 : index
    %93 = memref.load %arg2[%c2_52, %c0_53] : memref<8x3xf32, #tpu.memory_space<smem>>
    %94 = vector.broadcast %93 : f32 to vector<8x16xf32>
    %95 = arith.mulf %1, %94 : vector<8x16xf32>
    %c2_54 = arith.constant 2 : index
    %c1_55 = arith.constant 1 : index
    %96 = memref.load %arg2[%c2_54, %c1_55] : memref<8x3xf32, #tpu.memory_space<smem>>
    %97 = vector.broadcast %96 : f32 to vector<8x16xf32>
    %98 = arith.mulf %3, %97 : vector<8x16xf32>
    %99 = arith.addf %95, %98 : vector<8x16xf32>
    %c2_56 = arith.constant 2 : index
    %c2_57 = arith.constant 2 : index
    %100 = memref.load %arg2[%c2_56, %c2_57] : memref<8x3xf32, #tpu.memory_space<smem>>
    %101 = vector.broadcast %100 : f32 to vector<8x16xf32>
    %102 = arith.mulf %5, %101 : vector<8x16xf32>
    %103 = arith.addf %99, %102 : vector<8x16xf32>
    %c2_58 = arith.constant 2 : index
    %104 = memref.load %arg3[%c2_58] : memref<8xf32, #tpu.memory_space<smem>>
    %105 = vector.broadcast %104 : f32 to vector<8x16xf32>
    %106 = arith.addf %103, %105 : vector<8x16xf32>
    %cst_59 = arith.constant 0.000000e+00 : f32
    %cst_60 = arith.constant 6.000000e+00 : f32
    %107 = vector.broadcast %cst_59 : f32 to vector<8x16xf32>
    %108 = arith.maximumf %107, %106 : vector<8x16xf32>
    %109 = vector.broadcast %cst_60 : f32 to vector<8x16xf32>
    %110 = arith.minimumf %109, %108 : vector<8x16xf32>
    %cst_61 = arith.constant dense<0.000000e+00> : vector<8x32xf32>
    %111 = tpu.matmul %110, %7, %cst_61 {dimension_numbers = #tpu.dot_dimension_numbers<[1], [0], [0], [1], [0, 0, 1, 1], [], []>, precision = #tpu.contract_precision<fp32>} : vector<8x16xf32>, vector<16x32xf32>, vector<8x32xf32> -> vector<8x32xf32>
    %cst_62 = arith.constant dense<0.000000e+00> : vector<16x32xf32>
    %112 = tpu.matmul %6, %111, %cst_62 {dimension_numbers = #tpu.dot_dimension_numbers<[1], [0], [0], [1], [0, 0, 1, 1], [], []>, precision = #tpu.contract_precision<fp32>} : vector<16x8xf32>, vector<8x32xf32>, vector<16x32xf32> -> vector<16x32xf32>
    %c2_63 = arith.constant 2 : index
    %113 = memref.load %arg4[%c2_63] : memref<8xf32, #tpu.memory_space<smem>>
    %cst_64 = arith.constant -1.000000e+00 : f32
    %114 = vector.broadcast %cst_64 : f32 to vector<16x32xf32>
    %115 = vector.broadcast %113 : f32 to vector<16x32xf32>
    %116 = arith.select %26, %114, %115 : vector<16x32xi1>, vector<16x32xf32>
    %117 = arith.maximumf %112, %116 : vector<16x32xf32>
    %cst_65 = arith.constant -0.899999976 : f32
    %cst_66 = arith.constant 0.899999976 : f32
    %118 = vector.broadcast %cst_65 : f32 to vector<16x32xf32>
    %119 = arith.maximumf %118, %117 : vector<16x32xf32>
    %120 = vector.broadcast %cst_66 : f32 to vector<16x32xf32>
    %121 = arith.minimumf %120, %119 : vector<16x32xf32>
    %122 = math.tanh %121 : vector<16x32xf32>
    %c0_67 = arith.constant 0 : index
    %c2_68 = arith.constant 2 : index
    %c0_69 = arith.constant 0 : index
    %c0_70 = arith.constant 0 : index
    %123 = vector.load %arg8[%c0_67, %c2_68, %c0_69, %c0_70] : memref<1x8x16x32xf32, #tpu.memory_space<vmem>>, vector<1x1x16x32xf32>
    %124 = vector.shape_cast %123 : vector<1x1x16x32xf32> to vector<16x32xf32>
    %125 = vector.shape_cast %122 : vector<16x32xf32> to vector<1x1x16x32xf32>
    tpu.vector_store %arg8[%c0_67, %c2_68, %c0_69, %c0_70], %125 {strides = array<i32>} : memref<1x8x16x32xf32, #tpu.memory_space<vmem>>, vector<1x1x16x32xf32>,
    %c3 = arith.constant 3 : index
    %c0_71 = arith.constant 0 : index
    %126 = memref.load %arg2[%c3, %c0_71] : memref<8x3xf32, #tpu.memory_space<smem>>
    %127 = vector.broadcast %126 : f32 to vector<8x16xf32>
    %128 = arith.mulf %1, %127 : vector<8x16xf32>
    %c3_72 = arith.constant 3 : index
    %c1_73 = arith.constant 1 : index
    %129 = memref.load %arg2[%c3_72, %c1_73] : memref<8x3xf32, #tpu.memory_space<smem>>
    %130 = vector.broadcast %129 : f32 to vector<8x16xf32>
    %131 = arith.mulf %3, %130 : vector<8x16xf32>
    %132 = arith.addf %128, %131 : vector<8x16xf32>
    %c3_74 = arith.constant 3 : index
    %c2_75 = arith.constant 2 : index
    %133 = memref.load %arg2[%c3_74, %c2_75] : memref<8x3xf32, #tpu.memory_space<smem>>
    %134 = vector.broadcast %133 : f32 to vector<8x16xf32>
    %135 = arith.mulf %5, %134 : vector<8x16xf32>
    %136 = arith.addf %132, %135 : vector<8x16xf32>
    %c3_76 = arith.constant 3 : index
    %137 = memref.load %arg3[%c3_76] : memref<8xf32, #tpu.memory_space<smem>>
    %138 = vector.broadcast %137 : f32 to vector<8x16xf32>
    %139 = arith.addf %136, %138 : vector<8x16xf32>
    %cst_77 = arith.constant 0.000000e+00 : f32
    %cst_78 = arith.constant 6.000000e+00 : f32
    %140 = vector.broadcast %cst_77 : f32 to vector<8x16xf32>
    %141 = arith.maximumf %140, %139 : vector<8x16xf32>
    %142 = vector.broadcast %cst_78 : f32 to vector<8x16xf32>
    %143 = arith.minimumf %142, %141 : vector<8x16xf32>
    %cst_79 = arith.constant dense<0.000000e+00> : vector<8x32xf32>
    %144 = tpu.matmul %143, %7, %cst_79 {dimension_numbers = #tpu.dot_dimension_numbers<[1], [0], [0], [1], [0, 0, 1, 1], [], []>, precision = #tpu.contract_precision<fp32>} : vector<8x16xf32>, vector<16x32xf32>, vector<8x32xf32> -> vector<8x32xf32>
    %cst_80 = arith.constant dense<0.000000e+00> : vector<16x32xf32>
    %145 = tpu.matmul %6, %144, %cst_80 {dimension_numbers = #tpu.dot_dimension_numbers<[1], [0], [0], [1], [0, 0, 1, 1], [], []>, precision = #tpu.contract_precision<fp32>} : vector<16x8xf32>, vector<8x32xf32>, vector<16x32xf32> -> vector<16x32xf32>
    %c3_81 = arith.constant 3 : index
    %146 = memref.load %arg4[%c3_81] : memref<8xf32, #tpu.memory_space<smem>>
    %cst_82 = arith.constant -1.000000e+00 : f32
    %147 = vector.broadcast %cst_82 : f32 to vector<16x32xf32>
    %148 = vector.broadcast %146 : f32 to vector<16x32xf32>
    %149 = arith.select %26, %147, %148 : vector<16x32xi1>, vector<16x32xf32>
    %150 = arith.maximumf %145, %149 : vector<16x32xf32>
    %cst_83 = arith.constant -0.899999976 : f32
    %cst_84 = arith.constant 0.899999976 : f32
    %151 = vector.broadcast %cst_83 : f32 to vector<16x32xf32>
    %152 = arith.maximumf %151, %150 : vector<16x32xf32>
    %153 = vector.broadcast %cst_84 : f32 to vector<16x32xf32>
    %154 = arith.minimumf %153, %152 : vector<16x32xf32>
    %155 = math.tanh %154 : vector<16x32xf32>
    %c0_85 = arith.constant 0 : index
    %c3_86 = arith.constant 3 : index
    %c0_87 = arith.constant 0 : index
    %c0_88 = arith.constant 0 : index
    %156 = vector.load %arg8[%c0_85, %c3_86, %c0_87, %c0_88] : memref<1x8x16x32xf32, #tpu.memory_space<vmem>>, vector<1x1x16x32xf32>
    %157 = vector.shape_cast %156 : vector<1x1x16x32xf32> to vector<16x32xf32>
    %158 = vector.shape_cast %155 : vector<16x32xf32> to vector<1x1x16x32xf32>
    tpu.vector_store %arg8[%c0_85, %c3_86, %c0_87, %c0_88], %158 {strides = array<i32>} : memref<1x8x16x32xf32, #tpu.memory_space<vmem>>, vector<1x1x16x32xf32>,
    %c4 = arith.constant 4 : index
    %c0_89 = arith.constant 0 : index
    %159 = memref.load %arg2[%c4, %c0_89] : memref<8x3xf32, #tpu.memory_space<smem>>
    %160 = vector.broadcast %159 : f32 to vector<8x16xf32>
    %161 = arith.mulf %1, %160 : vector<8x16xf32>
    %c4_90 = arith.constant 4 : index
    %c1_91 = arith.constant 1 : index
    %162 = memref.load %arg2[%c4_90, %c1_91] : memref<8x3xf32, #tpu.memory_space<smem>>
    %163 = vector.broadcast %162 : f32 to vector<8x16xf32>
    %164 = arith.mulf %3, %163 : vector<8x16xf32>
    %165 = arith.addf %161, %164 : vector<8x16xf32>
    %c4_92 = arith.constant 4 : index
    %c2_93 = arith.constant 2 : index
    %166 = memref.load %arg2[%c4_92, %c2_93] : memref<8x3xf32, #tpu.memory_space<smem>>
    %167 = vector.broadcast %166 : f32 to vector<8x16xf32>
    %168 = arith.mulf %5, %167 : vector<8x16xf32>
    %169 = arith.addf %165, %168 : vector<8x16xf32>
    %c4_94 = arith.constant 4 : index
    %170 = memref.load %arg3[%c4_94] : memref<8xf32, #tpu.memory_space<smem>>
    %171 = vector.broadcast %170 : f32 to vector<8x16xf32>
    %172 = arith.addf %169, %171 : vector<8x16xf32>
    %cst_95 = arith.constant 0.000000e+00 : f32
    %cst_96 = arith.constant 6.000000e+00 : f32
    %173 = vector.broadcast %cst_95 : f32 to vector<8x16xf32>
    %174 = arith.maximumf %173, %172 : vector<8x16xf32>
    %175 = vector.broadcast %cst_96 : f32 to vector<8x16xf32>
    %176 = arith.minimumf %175, %174 : vector<8x16xf32>
    %cst_97 = arith.constant dense<0.000000e+00> : vector<8x32xf32>
    %177 = tpu.matmul %176, %7, %cst_97 {dimension_numbers = #tpu.dot_dimension_numbers<[1], [0], [0], [1], [0, 0, 1, 1], [], []>, precision = #tpu.contract_precision<fp32>} : vector<8x16xf32>, vector<16x32xf32>, vector<8x32xf32> -> vector<8x32xf32>
    %cst_98 = arith.constant dense<0.000000e+00> : vector<16x32xf32>
    %178 = tpu.matmul %6, %177, %cst_98 {dimension_numbers = #tpu.dot_dimension_numbers<[1], [0], [0], [1], [0, 0, 1, 1], [], []>, precision = #tpu.contract_precision<fp32>} : vector<16x8xf32>, vector<8x32xf32>, vector<16x32xf32> -> vector<16x32xf32>
    %c4_99 = arith.constant 4 : index
    %179 = memref.load %arg4[%c4_99] : memref<8xf32, #tpu.memory_space<smem>>
    %cst_100 = arith.constant -1.000000e+00 : f32
    %180 = vector.broadcast %cst_100 : f32 to vector<16x32xf32>
    %181 = vector.broadcast %179 : f32 to vector<16x32xf32>
    %182 = arith.select %26, %180, %181 : vector<16x32xi1>, vector<16x32xf32>
    %183 = arith.maximumf %178, %182 : vector<16x32xf32>
    %cst_101 = arith.constant -0.899999976 : f32
    %cst_102 = arith.constant 0.899999976 : f32
    %184 = vector.broadcast %cst_101 : f32 to vector<16x32xf32>
    %185 = arith.maximumf %184, %183 : vector<16x32xf32>
    %186 = vector.broadcast %cst_102 : f32 to vector<16x32xf32>
    %187 = arith.minimumf %186, %185 : vector<16x32xf32>
    %188 = math.tanh %187 : vector<16x32xf32>
    %c0_103 = arith.constant 0 : index
    %c4_104 = arith.constant 4 : index
    %c0_105 = arith.constant 0 : index
    %c0_106 = arith.constant 0 : index
    %189 = vector.load %arg8[%c0_103, %c4_104, %c0_105, %c0_106] : memref<1x8x16x32xf32, #tpu.memory_space<vmem>>, vector<1x1x16x32xf32>
    %190 = vector.shape_cast %189 : vector<1x1x16x32xf32> to vector<16x32xf32>
    %191 = vector.shape_cast %188 : vector<16x32xf32> to vector<1x1x16x32xf32>
    tpu.vector_store %arg8[%c0_103, %c4_104, %c0_105, %c0_106], %191 {strides = array<i32>} : memref<1x8x16x32xf32, #tpu.memory_space<vmem>>, vector<1x1x16x32xf32>,
    %c5 = arith.constant 5 : index
    %c0_107 = arith.constant 0 : index
    %192 = memref.load %arg2[%c5, %c0_107] : memref<8x3xf32, #tpu.memory_space<smem>>
    %193 = vector.broadcast %192 : f32 to vector<8x16xf32>
    %194 = arith.mulf %1, %193 : vector<8x16xf32>
    %c5_108 = arith.constant 5 : index
    %c1_109 = arith.constant 1 : index
    %195 = memref.load %arg2[%c5_108, %c1_109] : memref<8x3xf32, #tpu.memory_space<smem>>
    %196 = vector.broadcast %195 : f32 to vector<8x16xf32>
    %197 = arith.mulf %3, %196 : vector<8x16xf32>
    %198 = arith.addf %194, %197 : vector<8x16xf32>
    %c5_110 = arith.constant 5 : index
    %c2_111 = arith.constant 2 : index
    %199 = memref.load %arg2[%c5_110, %c2_111] : memref<8x3xf32, #tpu.memory_space<smem>>
    %200 = vector.broadcast %199 : f32 to vector<8x16xf32>
    %201 = arith.mulf %5, %200 : vector<8x16xf32>
    %202 = arith.addf %198, %201 : vector<8x16xf32>
    %c5_112 = arith.constant 5 : index
    %203 = memref.load %arg3[%c5_112] : memref<8xf32, #tpu.memory_space<smem>>
    %204 = vector.broadcast %203 : f32 to vector<8x16xf32>
    %205 = arith.addf %202, %204 : vector<8x16xf32>
    %cst_113 = arith.constant 0.000000e+00 : f32
    %cst_114 = arith.constant 6.000000e+00 : f32
    %206 = vector.broadcast %cst_113 : f32 to vector<8x16xf32>
    %207 = arith.maximumf %206, %205 : vector<8x16xf32>
    %208 = vector.broadcast %cst_114 : f32 to vector<8x16xf32>
    %209 = arith.minimumf %208, %207 : vector<8x16xf32>
    %cst_115 = arith.constant dense<0.000000e+00> : vector<8x32xf32>
    %210 = tpu.matmul %209, %7, %cst_115 {dimension_numbers = #tpu.dot_dimension_numbers<[1], [0], [0], [1], [0, 0, 1, 1], [], []>, precision = #tpu.contract_precision<fp32>} : vector<8x16xf32>, vector<16x32xf32>, vector<8x32xf32> -> vector<8x32xf32>
    %cst_116 = arith.constant dense<0.000000e+00> : vector<16x32xf32>
    %211 = tpu.matmul %6, %210, %cst_116 {dimension_numbers = #tpu.dot_dimension_numbers<[1], [0], [0], [1], [0, 0, 1, 1], [], []>, precision = #tpu.contract_precision<fp32>} : vector<16x8xf32>, vector<8x32xf32>, vector<16x32xf32> -> vector<16x32xf32>
    %c5_117 = arith.constant 5 : index
    %212 = memref.load %arg4[%c5_117] : memref<8xf32, #tpu.memory_space<smem>>
    %cst_118 = arith.constant -1.000000e+00 : f32
    %213 = vector.broadcast %cst_118 : f32 to vector<16x32xf32>
    %214 = vector.broadcast %212 : f32 to vector<16x32xf32>
    %215 = arith.select %26, %213, %214 : vector<16x32xi1>, vector<16x32xf32>
    %216 = arith.maximumf %211, %215 : vector<16x32xf32>
    %cst_119 = arith.constant -0.899999976 : f32
    %cst_120 = arith.constant 0.899999976 : f32
    %217 = vector.broadcast %cst_119 : f32 to vector<16x32xf32>
    %218 = arith.maximumf %217, %216 : vector<16x32xf32>
    %219 = vector.broadcast %cst_120 : f32 to vector<16x32xf32>
    %220 = arith.minimumf %219, %218 : vector<16x32xf32>
    %221 = math.tanh %220 : vector<16x32xf32>
    %c0_121 = arith.constant 0 : index
    %c5_122 = arith.constant 5 : index
    %c0_123 = arith.constant 0 : index
    %c0_124 = arith.constant 0 : index
    %222 = vector.load %arg8[%c0_121, %c5_122, %c0_123, %c0_124] : memref<1x8x16x32xf32, #tpu.memory_space<vmem>>, vector<1x1x16x32xf32>
    %223 = vector.shape_cast %222 : vector<1x1x16x32xf32> to vector<16x32xf32>
    %224 = vector.shape_cast %221 : vector<16x32xf32> to vector<1x1x16x32xf32>
    tpu.vector_store %arg8[%c0_121, %c5_122, %c0_123, %c0_124], %224 {strides = array<i32>} : memref<1x8x16x32xf32, #tpu.memory_space<vmem>>, vector<1x1x16x32xf32>,
    %c6 = arith.constant 6 : index
    %c0_125 = arith.constant 0 : index
    %225 = memref.load %arg2[%c6, %c0_125] : memref<8x3xf32, #tpu.memory_space<smem>>
    %226 = vector.broadcast %225 : f32 to vector<8x16xf32>
    %227 = arith.mulf %1, %226 : vector<8x16xf32>
    %c6_126 = arith.constant 6 : index
    %c1_127 = arith.constant 1 : index
    %228 = memref.load %arg2[%c6_126, %c1_127] : memref<8x3xf32, #tpu.memory_space<smem>>
    %229 = vector.broadcast %228 : f32 to vector<8x16xf32>
    %230 = arith.mulf %3, %229 : vector<8x16xf32>
    %231 = arith.addf %227, %230 : vector<8x16xf32>
    %c6_128 = arith.constant 6 : index
    %c2_129 = arith.constant 2 : index
    %232 = memref.load %arg2[%c6_128, %c2_129] : memref<8x3xf32, #tpu.memory_space<smem>>
    %233 = vector.broadcast %232 : f32 to vector<8x16xf32>
    %234 = arith.mulf %5, %233 : vector<8x16xf32>
    %235 = arith.addf %231, %234 : vector<8x16xf32>
    %c6_130 = arith.constant 6 : index
    %236 = memref.load %arg3[%c6_130] : memref<8xf32, #tpu.memory_space<smem>>
    %237 = vector.broadcast %236 : f32 to vector<8x16xf32>
    %238 = arith.addf %235, %237 : vector<8x16xf32>
    %cst_131 = arith.constant 0.000000e+00 : f32
    %cst_132 = arith.constant 6.000000e+00 : f32
    %239 = vector.broadcast %cst_131 : f32 to vector<8x16xf32>
    %240 = arith.maximumf %239, %238 : vector<8x16xf32>
    %241 = vector.broadcast %cst_132 : f32 to vector<8x16xf32>
    %242 = arith.minimumf %241, %240 : vector<8x16xf32>
    %cst_133 = arith.constant dense<0.000000e+00> : vector<8x32xf32>
    %243 = tpu.matmul %242, %7, %cst_133 {dimension_numbers = #tpu.dot_dimension_numbers<[1], [0], [0], [1], [0, 0, 1, 1], [], []>, precision = #tpu.contract_precision<fp32>} : vector<8x16xf32>, vector<16x32xf32>, vector<8x32xf32> -> vector<8x32xf32>
    %cst_134 = arith.constant dense<0.000000e+00> : vector<16x32xf32>
    %244 = tpu.matmul %6, %243, %cst_134 {dimension_numbers = #tpu.dot_dimension_numbers<[1], [0], [0], [1], [0, 0, 1, 1], [], []>, precision = #tpu.contract_precision<fp32>} : vector<16x8xf32>, vector<8x32xf32>, vector<16x32xf32> -> vector<16x32xf32>
    %c6_135 = arith.constant 6 : index
    %245 = memref.load %arg4[%c6_135] : memref<8xf32, #tpu.memory_space<smem>>
    %cst_136 = arith.constant -1.000000e+00 : f32
    %246 = vector.broadcast %cst_136 : f32 to vector<16x32xf32>
    %247 = vector.broadcast %245 : f32 to vector<16x32xf32>
    %248 = arith.select %26, %246, %247 : vector<16x32xi1>, vector<16x32xf32>
    %249 = arith.maximumf %244, %248 : vector<16x32xf32>
    %cst_137 = arith.constant -0.899999976 : f32
    %cst_138 = arith.constant 0.899999976 : f32
    %250 = vector.broadcast %cst_137 : f32 to vector<16x32xf32>
    %251 = arith.maximumf %250, %249 : vector<16x32xf32>
    %252 = vector.broadcast %cst_138 : f32 to vector<16x32xf32>
    %253 = arith.minimumf %252, %251 : vector<16x32xf32>
    %254 = math.tanh %253 : vector<16x32xf32>
    %c0_139 = arith.constant 0 : index
    %c6_140 = arith.constant 6 : index
    %c0_141 = arith.constant 0 : index
    %c0_142 = arith.constant 0 : index
    %255 = vector.load %arg8[%c0_139, %c6_140, %c0_141, %c0_142] : memref<1x8x16x32xf32, #tpu.memory_space<vmem>>, vector<1x1x16x32xf32>
    %256 = vector.shape_cast %255 : vector<1x1x16x32xf32> to vector<16x32xf32>
    %257 = vector.shape_cast %254 : vector<16x32xf32> to vector<1x1x16x32xf32>
    tpu.vector_store %arg8[%c0_139, %c6_140, %c0_141, %c0_142], %257 {strides = array<i32>} : memref<1x8x16x32xf32, #tpu.memory_space<vmem>>, vector<1x1x16x32xf32>,
    %c7 = arith.constant 7 : index
    %c0_143 = arith.constant 0 : index
    %258 = memref.load %arg2[%c7, %c0_143] : memref<8x3xf32, #tpu.memory_space<smem>>
    %259 = vector.broadcast %258 : f32 to vector<8x16xf32>
    %260 = arith.mulf %1, %259 : vector<8x16xf32>
    %c7_144 = arith.constant 7 : index
    %c1_145 = arith.constant 1 : index
    %261 = memref.load %arg2[%c7_144, %c1_145] : memref<8x3xf32, #tpu.memory_space<smem>>
    %262 = vector.broadcast %261 : f32 to vector<8x16xf32>
    %263 = arith.mulf %3, %262 : vector<8x16xf32>
    %264 = arith.addf %260, %263 : vector<8x16xf32>
    %c7_146 = arith.constant 7 : index
    %c2_147 = arith.constant 2 : index
    %265 = memref.load %arg2[%c7_146, %c2_147] : memref<8x3xf32, #tpu.memory_space<smem>>
    %266 = vector.broadcast %265 : f32 to vector<8x16xf32>
    %267 = arith.mulf %5, %266 : vector<8x16xf32>
    %268 = arith.addf %264, %267 : vector<8x16xf32>
    %c7_148 = arith.constant 7 : index
    %269 = memref.load %arg3[%c7_148] : memref<8xf32, #tpu.memory_space<smem>>
    %270 = vector.broadcast %269 : f32 to vector<8x16xf32>
    %271 = arith.addf %268, %270 : vector<8x16xf32>
    %cst_149 = arith.constant 0.000000e+00 : f32
    %cst_150 = arith.constant 6.000000e+00 : f32
    %272 = vector.broadcast %cst_149 : f32 to vector<8x16xf32>
    %273 = arith.maximumf %272, %271 : vector<8x16xf32>
    %274 = vector.broadcast %cst_150 : f32 to vector<8x16xf32>
    %275 = arith.minimumf %274, %273 : vector<8x16xf32>
    %cst_151 = arith.constant dense<0.000000e+00> : vector<8x32xf32>
    %276 = tpu.matmul %275, %7, %cst_151 {dimension_numbers = #tpu.dot_dimension_numbers<[1], [0], [0], [1], [0, 0, 1, 1], [], []>, precision = #tpu.contract_precision<fp32>} : vector<8x16xf32>, vector<16x32xf32>, vector<8x32xf32> -> vector<8x32xf32>
    %cst_152 = arith.constant dense<0.000000e+00> : vector<16x32xf32>
    %277 = tpu.matmul %6, %276, %cst_152 {dimension_numbers = #tpu.dot_dimension_numbers<[1], [0], [0], [1], [0, 0, 1, 1], [], []>, precision = #tpu.contract_precision<fp32>} : vector<16x8xf32>, vector<8x32xf32>, vector<16x32xf32> -> vector<16x32xf32>
    %c7_153 = arith.constant 7 : index
    %278 = memref.load %arg4[%c7_153] : memref<8xf32, #tpu.memory_space<smem>>
    %cst_154 = arith.constant -1.000000e+00 : f32
    %279 = vector.broadcast %cst_154 : f32 to vector<16x32xf32>
    %280 = vector.broadcast %278 : f32 to vector<16x32xf32>
    %281 = arith.select %26, %279, %280 : vector<16x32xi1>, vector<16x32xf32>
    %282 = arith.maximumf %277, %281 : vector<16x32xf32>
    %cst_155 = arith.constant -0.899999976 : f32
    %cst_156 = arith.constant 0.899999976 : f32
    %283 = vector.broadcast %cst_155 : f32 to vector<16x32xf32>
    %284 = arith.maximumf %283, %282 : vector<16x32xf32>
    %285 = vector.broadcast %cst_156 : f32 to vector<16x32xf32>
    %286 = arith.minimumf %285, %284 : vector<16x32xf32>
    %287 = math.tanh %286 : vector<16x32xf32>
    %c0_157 = arith.constant 0 : index
    %c7_158 = arith.constant 7 : index
    %c0_159 = arith.constant 0 : index
    %c0_160 = arith.constant 0 : index
    %288 = vector.load %arg8[%c0_157, %c7_158, %c0_159, %c0_160] : memref<1x8x16x32xf32, #tpu.memory_space<vmem>>, vector<1x1x16x32xf32>
    %289 = vector.shape_cast %288 : vector<1x1x16x32xf32> to vector<16x32xf32>
    %290 = vector.shape_cast %287 : vector<16x32xf32> to vector<1x1x16x32xf32>
    tpu.vector_store %arg8[%c0_157, %c7_158, %c0_159, %c0_160], %290 {strides = array<i32>} : memref<1x8x16x32xf32, #tpu.memory_space<vmem>>, vector<1x1x16x32xf32>,
    return
  }
  func.func @transform_0(%arg0: i32, %arg1: i32) -> (i32, i32) {
    %c0_i32 = arith.constant 0 : i32
    %c0_i32_0 = arith.constant 0 : i32
    %c0_i32_1 = arith.constant 0 : i32
    return %c0_i32, %c0_i32_0 : i32, i32
  }
  func.func @transform_1(%arg0: i32, %arg1: i32) -> i32 {
    %c0_i32 = arith.constant 0 : i32
    %c0_i32_0 = arith.constant 0 : i32
    return %c0_i32 : i32
  }
  func.func @transform_2(%arg0: i32, %arg1: i32) -> i32 {
    %c0_i32 = arith.constant 0 : i32
    %c0_i32_0 = arith.constant 0 : i32
    return %c0_i32 : i32
  }
  func.func @transform_3(%arg0: i32, %arg1: i32) -> (i32, i32, i32, i32) {
    %c0_i32 = arith.constant 0 : i32
    %c0_i32_0 = arith.constant 0 : i32
    %c0_i32_1 = arith.constant 0 : i32
    return %arg0, %c0_i32, %arg1, %c0_i32_0 : i32, i32, i32, i32
  }
  func.func @transform_4(%arg0: i32, %arg1: i32) -> (i32, i32) {
    %c0_i32 = arith.constant 0 : i32
    %c0_i32_0 = arith.constant 0 : i32
    %c0_i32_1 = arith.constant 0 : i32
    return %c0_i32, %c0_i32_0 : i32, i32
  }
  func.func @transform_5(%arg0: i32, %arg1: i32) -> (i32, i32) {
    %c0_i32 = arith.constant 0 : i32
    %c0_i32_0 = arith.constant 0 : i32
    %c0_i32_1 = arith.constant 0 : i32
    return %c0_i32, %c0_i32_0 : i32, i32
  }
  func.func @transform_6(%arg0: i32, %arg1: i32) -> (i32, i32, i32, i32) {
    %c0_i32 = arith.constant 0 : i32
    %c0_i32_0 = arith.constant 0 : i32
    %c0_i32_1 = arith.constant 0 : i32
    return %arg0, %c0_i32, %arg1, %c0_i32_0 : i32, i32, i32, i32
  }
}

</mosaic_0001>

<bundles_post_ra>
// kernel: model_forward.1
= control target key start
LH: loop header
LB: loop body
LE: loop exit
PB: predicated region body
PF: predicated region fallthrough
CT: control target
= control target key end

     0   :  { %s10644_s0 = inlined_call_operand.vmem [shape: f32[8,3], index: 0, kind: input, shape index: {}]   ;;  %s10645_s1 = inlined_call_operand.vmem [shape: f32[8], index: 1, kind: input, shape index: {}]   ;;  %s10646_s2 = inlined_call_operand.vmem [shape: f32[8], index: 2, kind: input, shape index: {}]   ;;  %s10647_s3 = inlined_call_operand.vmem [shape: f32[2,3,16,16], index: 3, kind: input, shape index: {}]   ;;  %s10648_s4 = inlined_call_operand.vmem [shape: f32[16,8], index: 4, kind: input, shape index: {}]   ;;  %s10649_s5 = inlined_call_operand.vmem [shape: f32[16,32], index: 5, kind: input, shape index: {}]   ;;  %s10650_s6 = inlined_call_operand.hbm [shape: f32[2,8,32,32], index: 6, kind: output, shape index: {}]  }
   0x1   :  { %10657 = sst [smem:[#allocation17_spill]] %s10645_s1 }
   0x2   :  { %11 = vsyncpa [#allocation4], 0 }
   0x3   :  { %12 = vsyncpa [#allocation6], 0 }
   0x4   :  { %13 = vsyncpa [#allocation3], 0 }
   0x5   :  { %15 = vsyncpa [#allocation3 + $0x1], 0  ;;  %s9989_s21 = smov 0   ;;  %s9991_s22 = smov 0  }
   0x6   :  { %s9993_s23 = smov 0   ;;  %s9995_s24 = smov 0  }
   0x7   :  { %s9997_s25 = smov 0   ;;  %s9999_s26 = smov 0  }
   0x8   :  { %s10001_s27 = smov 0   ;;  %s10003_s28 = smov 0  }
   0x9 LB: > { %s8411_s29 = sadd.s32 4294967295, %s9939_s28   ;;  %s8412_s30 = sadd.s32 4294967294, %s9939_s28   ;;  %s9939_s28 = sphi %s10003_s28, %s21_s28   ;;  %s9935_s27 = sphi %s10001_s27, %s10684_s27   ;;  %s9931_s26 = sphi %s9999_s26, %s10683_s26   ;;  %s9927_s25 = sphi %s9997_s25, %s10682_s25   ;;  %s9923_s24 = sphi %s9995_s24, %s10681_s24   ;;  %s9919_s23 = sphi %s9993_s23, %s10680_s23   ;;  %s9915_s22 = sphi %s9991_s22, %s10679_s22   ;;  %s9911_s21 = sphi %s9989_s21, %s10678_s21  }
   0xa   : > { %s30_s7 = sadd.s32 1, %s9931_s26  ;;  %s33_s8 = sadd.s32 1, %s9935_s27 }
   0xb   : > { %p31_p0 = scmp.ge.s32.totalorder %s30_s7, 2  ;;  %s105_s9 = sadd.s32 1, %s9919_s23 }
   0xc   : > { %p112_p1 = scmp.ne.s32.totalorder %s9919_s23, %s9915_s22  ;;  %p113_p2 = scmp.eq.s32.totalorder %s9939_s28, 0 }
   0xd   : > { %s10686_s7 = smov (%p31_p0, %s30_s7), 0  ;;  %s10688_s8 = smov (!%p31_p0, %s33_s8), %s9935_s27 }
   0xe   : > { %10658 = sst [smem:[#allocation15_spill]] %s10686_s7  ;;  %s101_s10 = ssub.s32 %s9931_s26, %s10686_s7 }
   0xf   : > { %p10042_p3 = por %p113_p2, %p112_p1  ;;  %p35_p4 = scmp.ge.s32.totalorder %s10688_s8, 2 }
  0x10   : > { %p186_p5 = scmp.eq.s32.totalorder %s8411_s29, 3  ;;  %p191_p6 = scmp.ne.s32.totalorder %s9915_s22, %s9911_s21 }
  0x11   : > { %s10659_s11 = scalar_select %p10042_p3, 1, 0 }
  0x12   : > { %p192_p7 = scmp.eq.s32.totalorder %s8412_s30, 3  ;;  %s10690_s8 = smov (%p35_p4, %s10688_s8), 0 }
  0x13   : > { %10660 = sst [smem:[#allocation16_spill]] %s10690_s8  ;;  %p10050_p8 = por %p186_p5, %p112_p1 }
  0x14   : > { %p10054_p9 = por %p192_p7, %p191_p6  ;;  %s100_s14 = ssub.s32 %s9935_s27, %s10690_s8 }
  0x15   : > { %s10661_s12 = scalar_select %p10050_p8, 1, 0 }
  0x16   : > { %s10662_s13 = scalar_select %p10054_p9, 1, 0 }
  0x17   : > { %p8413_p10 = scmp.ge.s32.totalorder %s9939_s28, 1  ;;  %s102_s15 = sor.u32 %s101_s10, %s100_s14 }
  0x18   : > { %p199_p11 = scmp.lt.s32.totalorder %s9939_s28, 5  ;;  %p103_p12 = scmp.eq.s32.totalorder %s102_s15, 0 }
  0x19   : > { %p10066_p0 = scmp.eq.s32.totalorder %s8411_s29, 0  ;;  %s10665_s1 = sld [smem:[#allocation17_spill]] }
  0x1a   : > { %p10062_p13 = pnand %p8413_p10, %p199_p11 }
  0x1b   : > { %s10664_s17 = scalar_select %p10066_p0, 1, 0 }
  0x1c   : > { %s10663_s16 = scalar_select %p10062_p13, 1, 0 }
  0x1d   : > { %s10071_s18 = scalar_select %p103_p12, %s9919_s23, %s105_s9  }
  0x1e   : > { %p9690_p1 = pneg %p10062_p13 }
  0x1f   : > { %s223_s30 = sshll.u32 %s10665_s1, 4  ;;  %s224_s30 = int_to_ptr.vmem [resolvable:$true] %s223_s30 }
  0x20   : > { %p10080_p2 = pnand %p10066_p0, %p9690_p1  ;;  %s9820_s29 = scalar_lea.vmem %s224_s30, 16 }
  0x21   : > { %p9821_p4 = scmp.ne.s32.totalorder %s224_s30, %s9820_s29  ;;  %p9828_p10 = scmp.lt.s32.totalorder %s224_s30, %s224_s30 }
  0x22   : > { %p9822_p5 = pneg %p10080_p2  ;;  %p9829_p11 = scmp.lt.s32.totalorder %s9820_s29, %s9820_s29 }
  0x24   : > { %p9823_p6 = pnand %p9822_p5, %p9821_p4  ;;  %p9830_p12 = por %p9829_p11, %p9828_p10 }
  0x26   : > { %p9824_p7 = pneg %p9823_p6 }
  0x28   : > { %p9831_p9 = pnand %p9830_p12, %p9824_p7 }
  0x2a   : > { %9834 = shalt.err (!%p9831_p9)
}
  0x2b   : > { %s9941_s9 = smov [#allocation5]   ;;  %s212_s19 = sshll.u32 %s10644_s0, 4  ;;  %s213_s19 = int_to_ptr.vmem [resolvable:$true] %s212_s19 }
  0x2c   : > { %9696 = dma.vmem_to_smem (!%p10080_p2), %s224_s30, 16, %s9941_s9, [#allocation6]  }
  0x2d   : > { %s234_s8 = sshll.u32 %s10646_s2, 4  ;;  %s9835_s7 = scalar_lea.vmem %s213_s19, 128  ;;  %s235_s8 = int_to_ptr.vmem [resolvable:$true] %s234_s8 }
  0x2e   : > { %p9836_p1 = scmp.ne.s32.totalorder %s213_s19, %s9835_s7  ;;  %p9843_p6 = scmp.lt.s32.totalorder %s213_s19, %s213_s19 }
  0x2f   : > { %p9844_p7 = scmp.lt.s32.totalorder %s9835_s7, %s9835_s7 }
  0x30   : > { %p9838_p4 = pnand %p9836_p1, %p9822_p5 }
  0x31   : > { %p9845_p10 = por %p9844_p7, %p9843_p6 }
  0x32   : > { %p9839_p9 = pneg %p9838_p4 }
  0x34   : > { %p9846_p11 = pnand %p9845_p10, %p9839_p9 }
  0x36   : > { %9849 = shalt.err (!%p9846_p11)
}
  0x37   : > { %s9942_s30 = smov [#allocation2]   ;;  %s9850_s29 = scalar_lea.vmem %s235_s8, 16 }
  0x38   : > { %9693 = dma.vmem_to_smem (!%p10080_p2), %s213_s19, 128, %s9942_s30, [#allocation4]  }
  0x39   : > { %p9851_p12 = scmp.ne.s32.totalorder %s235_s8, %s9850_s29  ;;  %p9858_p13 = scmp.lt.s32.totalorder %s235_s8, %s235_s8 }
  0x3a   : > { %p9859_p1 = scmp.lt.s32.totalorder %s9850_s29, %s9850_s29 }
  0x3b   : > { %p9853_p8 = pnand %p9851_p12, %p9822_p5 }
  0x3c   : > { %p9860_p4 = por %p9859_p1, %p9858_p13 }
  0x3d   : > { %p9854_p0 = pneg %p9853_p8 }
  0x3f   : > { %p9861_p3 = pnand %p9860_p4, %p9854_p0 }
  0x41   : > { %9864 = shalt.err (!%p9861_p3)
}
  0x42   : > { %s9943_s1 = smov [#allocation7]   ;;  %p8417_p9 = scmp.ge.s32.totalorder %s9939_s28, 4 }
  0x43   : > { %9699 = dma.vmem_to_smem (!%p10080_p2), %s235_s8, 16, %s9943_s1, [#allocation6]  }
  0x44   : > { %247 = sbr.rel (%p8417_p9) target bundleno = 84 (0x54), region = 36  ;;  %p10667_p6 = scmp.ne.s32.totalorder (!%p8417_p9), %s10659_s11, 0 }
  0x4b   : > { %250 = sbr.rel (!%p10667_p6) target bundleno = 84 (0x54), region = 40  ;;  %s252_s7 = sand.u32 (%p10667_p6), 1, %s9919_s23  }
  0x4c   : > { %s9668_s9 = smul.u32 (%p10667_p6), 6, %s9935_s27 }
  0x4d   : > { %s9667_s14 = smul.u32 (%p10667_p6), 24, %s252_s7 }
  0x4e   : > { %s256_s15 = sadd.s32 (%p10667_p6), %s9931_s26, %s9668_s9 }
  0x4f   : > { %s8418_s19 = sshll.u32 (%p10667_p6), %s256_s15, 3  ;;  %s254_s8 = scalar_lea.vmem (%p10667_p6), [#allocation8], %s9667_s14 }
  0x50   : > { %s258_s29 = scalar_lea.vmem (%p10667_p6), %s10647_s3, %s8418_s19 }
  0x51   : > { %v290_v0 = vld [vmem:[%s258_s29] sm:$0xff] (%p10667_p6)  ;;  %v292_v1 = vld [vmem:[%s258_s29 + $0x10] sm:$0xff] (%p10667_p6) }
  0x52   : > { %v294_v2 = vld [vmem:[%s258_s29 + $0x20] sm:$0xff]  ;;  %291 = vst [vmem:[%s254_s8] sm:$0xff] %v290_v0  ;;  %293 = vst [vmem:[%s254_s8 + $0x8] sm:$0xff] %v292_v1 }
  0x53   : > { %295 = vst [vmem:[%s254_s8 + $0x10] sm:$0xff] %v294_v2 }
  0x54 PF: > { %p10668_p3 = scmp.ne.s32.totalorder %s10663_s16, 0 }
  0x55   : > { %p10669_p8 = scmp.ne.s32.totalorder (!%p10668_p3), %s10664_s17, 0 }
  0x56   : > { %304 = sbr.rel (%p10668_p3) target bundleno = 1234 (0x4d2), region = 78 }
  0x5d   : > { %9898 = dma.done.wait (%p10669_p8), [#allocation4], 128  }
  0x5e   : > { %9900 = vsyncadd (%p10669_p8), [#allocation4], 4294967168 }
  0x5f   : > { %9902 = dma.done.wait (%p10669_p8), [#allocation6], 32  }
  0x60   : > { %9904 = vsyncadd (%p10669_p8), [#allocation6], 4294967264  ;;  %s10127_s11 = sand.u32 1, %s9915_s22  }
  0x61   : > { %s9669_s10 = smul.u32 24, %s10127_s11 }
  0x63   : > { %s321_s1 = scalar_lea.vmem [#allocation8], %s9669_s10 }
  0x64   : > { %325 = sfence }
  0x65   : > { %v357_v3 = vld [vmem:[%s10649_s5] sm:$0xff]  ;;  %v358_v4 = vld [vmem:[%s10649_s5 + $0x8] sm:$0xff]  ;;  %v9944_v5 = vmov 0.0|0.0   ;;  %vm9945_vm0 = vmmov 0   ;;  %v9946_v8 = vmov 0.0   ;;  %s387_s17 = sld [smem:[#allocation2]] }
  0x66   : > { %9363 = vmatprep.subr.bf16.mxu0 %v9944_v5  ;;  %v408_v6 = vand.u32 4294901760, %v357_v3  ;;  %v411_v7 = vand.u32 4294901760, %v358_v4  ;;  %8791 = vmatprep.mubr.msk.f32.mxu0 %vm9945_vm0, %v9946_v8  ;;  %s8426_s15 = sld [smem:[#allocation2 + $0x1]]  ;;  %s8427_s19 = sld [smem:[#allocation2 + $0x2]]  ;;  %v10142_v10 = vld [vmem:[%s321_s1] sm:$0xff]  ;;  %v10144_v11 = vld [vmem:[%s321_s1 + $0x8] sm:$0xff] }
  0x67   : > { %s398_s20 = sld [smem:[#allocation5]]  ;;  %v10146_v12 = vld [vmem:[%s321_s1 + $0x10] sm:$0xff]  ;;  %vm403_vm1 = vcmask 130048   ;;  %v355_v42 = vld [vmem:[%s10648_s4] sm:$0xff]  ;;  %vm866_vm2 = vcmask 64512   ;;  %s8431_s16 = sld [smem:[#allocation2 + $0x81]] }
  0x68   : > { %v10139_v9 = vpack.c.bf16 %v411_v7, %v408_v6  ;;  %v486_v22 = vsub.f32 %v357_v3, %v408_v6  ;;  %v493_v23 = vsub.f32 %v358_v4, %v411_v7  ;;  %v868_v43 = vsel %vm866_vm2, %v355_v42, 0  ;;  %v356_v49 = vld [vmem:[%s10648_s4 + $0x8] sm:$0xff]  ;;  %s8430_s1 = sld [smem:[#allocation2 + $0x80]]  ;;  %s8432_s7 = sld [smem:[#allocation2 + $0x82]] }
  0x69   : > { %v10181_v44 = vand.u32 4294901760, %v868_v43  ;;  %v871_v50 = vsel %vm866_vm2, %v356_v49, 0  ;;  %s8433_s9 = sld [smem:[#allocation5 + $0x1]]  ;;  %s8439_s14 = sld [smem:[#allocation2 + $0x100]]  ;;  %vm1374_vm14 = vcmask 261120  }
  0x6a   : > { %9365 = vmatpush3.bf16.msra.mxu0 %v10139_v9  ;;  %v487_v26 = vand.u32 4294901760, %v486_v22  ;;  %v494_v27 = vand.u32 4294901760, %v493_v23  ;;  %v10159_v40 = vpack.c.bf16 %v493_v23, %v486_v22  ;;  %v10198_v51 = vand.u32 4294901760, %v871_v50  ;;  %s8449_s30 = sld [smem:[#allocation2 + $0x181]]  ;;  %s8450_s29 = sld [smem:[#allocation2 + $0x182]] }
  0x6b   : > { %9366 = vmatprep.subr.bf16.mxu0 %v9944_v5  ;;  %v388_v13 = vstv %s387_s17  ;;  %v10184_v45 = vsub.f32 %v868_v43, %v10181_v44  ;;  %s8440_s17 = sld [smem:[#allocation2 + $0x101]]  ;;  %s8451_s8 = sld [smem:[#allocation5 + $0x3]] }
  0x6c   : > { %v389_v14 = vmul.f32 %v388_v13, %v10142_v10  ;;  %v391_v15 = vstv %s8426_s15  ;;  %v395_v16 = vstv %s8427_s19  ;;  %v488_v30 = vsub.f32 %v486_v22, %v487_v26  ;;  %s8441_s15 = sld [smem:[#allocation2 + $0x102]]  ;;  %s8457_s10 = sld [smem:[#allocation2 + $0x200]] }
  0x6d   : > { %v392_v17 = vmul.f32 %v10144_v11, %v391_v15  ;;  %v396_v18 = vmul.f32 %v10146_v12, %v395_v16  ;;  %v399_v20 = vstv %s398_s20  ;;  %v495_v31 = vsub.f32 %v493_v23, %v494_v27  ;;  %s8442_s19 = sld [smem:[#allocation5 + $0x2]]  ;;  %s8448_s20 = sld [smem:[#allocation2 + $0x180]] }
  0x6e   : > { %v489_v34 = vand.u32 4294901760, %v488_v30  ;;  %v10169_v41 = vpack.c.bf16 %v494_v27, %v487_v26  ;;  %v10187_v46 = vand.u32 4294901760, %v10184_v45  ;;  %v10201_v52 = vsub.f32 %v871_v50, %v10198_v51  ;;  %p360_p13 = scmp.eq.s32.totalorder %s9923_s24, 1  ;;  %p359_p0 = scmp.eq.s32.totalorder %s9923_s24, 0 }
  0x6f   : > { %v393_v19 = vadd.f32 %v392_v17, %v389_v14  ;;  %v496_v35 = vand.u32 4294901760, %v495_v31  ;;  %v1378_v55 = vstv %s8430_s1  ;;  %v1381_v56 = vstv %s8431_s16  ;;  %s8458_s1 = sld [smem:[#allocation2 + $0x201]]  ;;  %s8459_s16 = sld [smem:[#allocation2 + $0x202]] }
  0x70   : > { %v942_v47 = vsub.f32 %v10184_v45, %v10187_v46  ;;  %v10204_v53 = vand.u32 4294901760, %v10201_v52  ;;  %v1379_v61 = vmul.f32 %v1378_v55, %v10142_v10  ;;  %v1382_v62 = vmul.f32 %v10144_v11, %v1381_v56 }
  0x71   : > { %v397_v21 = vadd.f32 %v396_v18, %v393_v19  ;;  %v10153_v38 = vpack.c.bf16 %v496_v35, %v489_v34  ;;  %v1385_v0 = vstv %s8432_s7  ;;  %v1389_v13 = vstv %s8433_s9  ;;  %s8460_s7 = sld [smem:[#allocation5 + $0x4]]  ;;  %s8466_s9 = sld [smem:[#allocation2 + $0x280]] }
  0x72   : > { %v10191_v48 = vand.u32 4294901760, %v942_v47  ;;  %v952_v54 = vsub.f32 %v10201_v52, %v10204_v53  ;;  %v1383_v2 = vadd.f32 %v1382_v62, %v1379_v61  ;;  %v1386_v3 = vmul.f32 %v10146_v12, %v1385_v0 }
  0x73   : > { %v400_v24 = vadd.f32 %v399_v20, %v397_v21  ;;  %v2360_v22 = vstv %s8439_s14  ;;  %v2363_v23 = vstv %s8440_s17  ;;  %v2367_v27 = vstv %s8441_s15  ;;  %s8467_s14 = sld [smem:[#allocation2 + $0x281]]  ;;  %s8468_s17 = sld [smem:[#allocation2 + $0x282]] }
  0x74   : > { %8831 = vmatprep.mubr.f32.mxu1 %v10191_v48  ;;  %v10208_v60 = vand.u32 4294901760, %v952_v54  ;;  %v1387_v7 = vadd.f32 %v1386_v3, %v1383_v2  ;;  %v2364_v26 = vmul.f32 %v10144_v11, %v2363_v23  ;;  %v2371_v31 = vstv %s8442_s19  ;;  %s8469_s15 = sld [smem:[#allocation5 + $0x5]]  ;;  %s8475_s19 = sld [smem:[#allocation2 + $0x300]] }
  0x75   : > { %v401_v25 = vmax.f32 %v400_v24, 0.0  ;;  %v3342_v43 = vstv %s8448_s20  ;;  %v3345_v47 = vstv %s8449_s30  ;;  %v3349_v55 = vstv %s8450_s29  ;;  %s8476_s20 = sld [smem:[#allocation2 + $0x301]]  ;;  %s8477_s30 = sld [smem:[#allocation2 + $0x302]] }
  0x76   : > { %v1390_v14 = vadd.f32 %v1389_v13, %v1387_v7  ;;  %v3343_v50 = vmul.f32 %v3342_v43, %v10142_v10  ;;  %v3346_v54 = vmul.f32 %v10144_v11, %v3345_v47  ;;  %v4327_v7 = vstv %s8458_s1  ;;  %s8478_s29 = sld [smem:[#allocation5 + $0x6]]  ;;  %s1362_s1 = sld [smem:[#allocation7]] }
  0x77   : > { %v402_v28 = vmin.f32 %v401_v25, 6.0  ;;  %v2361_v25 = vmul.f32 %v2360_v22, %v10142_v10 }
  0x78   : > { %v1391_v15 = vmax.f32 %v1390_v14, 0.0  ;;  %v3347_v56 = vadd.f32 %v3346_v54, %v3343_v50 }
  0x79   : > { %v405_v29 = vsel %vm403_vm1, %v402_v28, 0  ;;  %v2365_v28 = vadd.f32 %v2364_v26, %v2361_v25 }
  0x7a   : > { %v474_v32 = vand.u32 4294901760, %v405_v29  ;;  %v1392_v16 = vmin.f32 %v1391_v15, 6.0  ;;  %v4328_v15 = vmul.f32 %v10144_v11, %v4327_v7 }
  0x7c   : > { %v475_v33 = vsub.f32 %v405_v29, %v474_v32  ;;  %v1394_v17 = vsel %vm403_vm1, %v1392_v16, 0  ;;  %v2368_v29 = vmul.f32 %v10146_v12, %v2367_v27  ;;  %v4331_v16 = vstv %s8459_s16  ;;  %s8484_s16 = sld [smem:[#allocation2 + $0x380]] }
  0x7d   : > { %v1463_v18 = vand.u32 4294901760, %v1394_v17 }
  0x7e   : > { %v476_v36 = vand.u32 4294901760, %v475_v33  ;;  %v2369_v30 = vadd.f32 %v2368_v29, %v2365_v28  ;;  %v5306_v29 = vstv %s8466_s9  ;;  %s8486_s9 = sld [smem:[#allocation2 + $0x382]] }
  0x7f   : > { %v1464_v19 = vsub.f32 %v1394_v17, %v1463_v18 }
  0x80   : > { %v477_v37 = vsub.f32 %v475_v33, %v476_v36 }
  0x81   : > { %v1465_v20 = vand.u32 4294901760, %v1464_v19 }
  0x82   : > { %v478_v39 = vand.u32 4294901760, %v477_v37 }
  0x83   : > { %v1466_v21 = vsub.f32 %v1464_v19, %v1465_v20 }
  0x84   : > { %8792 = vmatmul.mubr.f32.vlgmr.msra.gmra.mrb[0].mxu0 %v478_v39 }
  0x85   : > { %9368 = vmatpush3.bf16.msra.mxu0 %v10153_v38  ;;  %8798 = vmatprep.mubr.msk.f32.mxu0 %vm9945_vm0, %v9946_v8  ;;  %v1467_v24 = vand.u32 4294901760, %v1466_v21 }
  0x86   : > { %9369 = vmatprep.subr.bf16.mxu0 %v9944_v5 }
  0x8c   : > { %8799 = vmatmul.mubr.f32.vlgmr.msra.gmra.mrb[0].mxu0 %v474_v32 }
  0x8d   : > { %9371 = vmatpush3.bf16.msra.mxu0 %v10159_v40  ;;  %8805 = vmatprep.mubr.msk.f32.mxu0 %vm9945_vm0, %v9946_v8 }
  0x8e   : > { %9372 = vmatprep.subr.bf16.mxu0 %v9944_v5 }
  0x94   : > { %8806 = vmatmul.mubr.f32.vlgmr.msra.gmra.mrb[0].mxu0 %v475_v33 }
  0x95   : > { %9374 = vmatpush3.bf16.msra.mxu0 %v10139_v9  ;;  %8812 = vmatprep.mubr.msk.f32.mxu0 %vm9945_vm0, %v9946_v8 }
  0x96   : > { %9375 = vmatprep.subr.bf16.mxu0 %v9944_v5 }
  0x9c   : > { %8813 = vmatmul.mubr.f32.vlgmr.msra.gmra.mrb[0].mxu0 %v476_v36 }
  0x9d   : > { %9377 = vmatpush3.bf16.msra.mxu0 %v10169_v41  ;;  %8819 = vmatprep.mubr.msk.f32.mxu0 %vm9945_vm0, %v9946_v8 }
  0x9e   : > { %9378 = vmatprep.subr.bf16.mxu0 %v9944_v5 }
  0xa4   : > { %8820 = vmatmul.mubr.f32.vlgmr.msra.gmra.mrb[0].mxu0 %v474_v32 }
  0xa5   : > { %9380 = vmatpush3.bf16.msra.mxu0 %v10139_v9  ;;  %8826 = vmatprep.mubr.msk.f32.mxu0 %vm9945_vm0, %v9946_v8 }
  0xac   : > { %8827 = vmatmul.mubr.f32.vlgmr.msra.gmra.mrb[0].mxu0 %v474_v32  ;;  %v2372_v32 = vadd.f32 %v2371_v31, %v2369_v30  ;;  %v5309_v30 = vstv %s8467_s14  ;;  %s8423_s14 = sshll.u32 %s10127_s11, 7 }
  0xad   : > { %8903 = vmatprep.mubr.f32.mxu0 %v10191_v48 }
  0xae   : > { %v2373_v33 = vmax.f32 %v2372_v32, 0.0  ;;  %v5307_v32 = vmul.f32 %v5306_v29, %v10142_v10 }
  0xb0   : > { %v2374_v34 = vmin.f32 %v2373_v33, 6.0  ;;  %v5310_v33 = vmul.f32 %v10144_v11, %v5309_v30 }
  0xb2   : > { %v2376_v35 = vsel %vm403_vm1, %v2374_v34, 0  ;;  %v5313_v34 = vstv %s8468_s17  ;;  %s8487_s17 = sld [smem:[#allocation5 + $0x7]] }
  0xb3   : > { %v2445_v36 = vand.u32 4294901760, %v2376_v35 }
  0xb5   : > { %v2446_v37 = vsub.f32 %v2376_v35, %v2445_v36  ;;  %v5311_v35 = vadd.f32 %v5310_v33, %v5307_v32 }
  0xb7   : > { %v2447_v39 = vand.u32 4294901760, %v2446_v37 }
  0xb9   : > { %v2448_v42 = vsub.f32 %v2446_v37, %v2447_v39 }
  0xbb   : > { %v2449_v49 = vand.u32 4294901760, %v2448_v42 }
 0x17f   : > { %v862_v57 = vpop.f32.mrb[0].mxu0 }
 0x180   : > { %v874_v58 = vand.u32 4294901760, %v862_v57  ;;  %v8828_v59 = vpop.f32.mrb[1].mxu0 }
 0x181   : > { %v3353_v59 = vstv %s8451_s8  ;;  %s375_s8 = scalar_select %p360_p13, 1, 0 }
 0x182   : > { %v961_v63 = vsub.f32 %v862_v57, %v874_v58  ;;  %8829 = vmatprep.subr.mxu1 %v874_v58  ;;  %v3350_v57 = vmul.f32 %v10146_v12, %v3349_v55 }
 0x183   : > { %8830 = vmatpush3.msra.mxu1 %v874_v58 }
 0x184   : > { %8832 = vmatmul.mubr.f32.vlgmr.msra.gmra.mrb[0].mxu1 %v10208_v60  ;;  %v962_v1 = vand.u32 4294901760, %v961_v63 }
 0x185   : > { %8836 = vmatprep.mubr.f32.mxu1 %v10181_v44 }
 0x186   : > { %v963_v4 = vsub.f32 %v961_v63, %v962_v1 }
 0x188   : > { %v964_v6 = vand.u32 4294901760, %v963_v4 }
 0x18a   : > { %8834 = vmatprep.subr.mxu1 %v964_v6 }
 0x18b   : > { %8835 = vmatpush3.msra.mxu1 %v964_v6  ;;  %v4324_v6 = vstv %s8457_s10  ;;  %s368_s10 = scalar_select %p359_p0, 1, 0 }
 0x18c   : > { %8837 = vmatmul.mubr.f32.vlgmr.msra.gmra.mrb[0].mxu1 %v10198_v51  ;;  %8839 = vmatprep.subr.mxu1 %v961_v63  ;;  %v4325_v14 = vmul.f32 %v4324_v6, %v10142_v10 }
 0x18d   : > { %8840 = vmatpush3.msra.mxu1 %v961_v63  ;;  %8841 = vmatprep.mubr.f32.mxu1 %v10184_v45 }
 0x18e   : > { %8844 = vmatprep.subr.mxu1 %v874_v58  ;;  %v4329_v17 = vadd.f32 %v4328_v15, %v4325_v14 }
 0x194   : > { %8842 = vmatmul.mubr.f32.vlgmr.msra.gmra.mrb[0].mxu1 %v10201_v52 }
 0x195   : > { %8845 = vmatpush3.msra.mxu1 %v874_v58  ;;  %8846 = vmatprep.mubr.f32.mxu1 %v10187_v46 }
 0x196   : > { %8849 = vmatprep.subr.mxu1 %v962_v1 }
 0x19c   : > { %8847 = vmatmul.mubr.f32.vlgmr.msra.gmra.mrb[0].mxu1 %v10204_v53 }
 0x19d   : > { %8850 = vmatpush3.msra.mxu1 %v962_v1  ;;  %8851 = vmatprep.mubr.f32.mxu1 %v10181_v44 }
 0x19e   : > { %8854 = vmatprep.subr.mxu1 %v874_v58 }
 0x1a4   : > { %8852 = vmatmul.mubr.f32.vlgmr.msra.gmra.mrb[0].mxu1 %v10198_v51 }
 0x1a5   : > { %8855 = vmatpush3.msra.mxu1 %v874_v58  ;;  %8856 = vmatprep.mubr.f32.mxu1 %v10181_v44  ;;  %v3351_v58 = vadd.f32 %v3350_v57, %v3347_v56  ;;  %v6288_v57 = vstv %s8475_s19  ;;  %s8434_s19 = sld [smem:[#allocation7 + $0x1]] }
 0x1a6   : > { %9381 = vmatprep.subr.bf16.mxu1 %v9944_v5 }
 0x1a7   : > { %v3354_v61 = vadd.f32 %v3353_v59, %v3351_v58  ;;  %v6291_v58 = vstv %s8476_s20  ;;  %s8443_s20 = sld [smem:[#allocation7 + $0x2]] }
 0x1a9   : > { %v3355_v62 = vmax.f32 %v3354_v61, 0.0  ;;  %v6289_v61 = vmul.f32 %v6288_v57, %v10142_v10 }
 0x1ab   : > { %v3356_v63 = vmin.f32 %v3355_v62, 6.0  ;;  %v6292_v62 = vmul.f32 %v10144_v11, %v6291_v58 }
 0x1ac   : > { %8857 = vmatmul.mubr.f32.vlgmr.msra.gmra.mrb[0].mxu1 %v10198_v51 }
 0x1ad   : > { %9383 = vmatpush3.bf16.msra.mxu1 %v10139_v9  ;;  %8863 = vmatprep.mubr.msk.f32.mxu1 %vm9945_vm0, %v9946_v8  ;;  %v3358_v0 = vsel %vm403_vm1, %v3356_v63, 0  ;;  %v6295_v63 = vstv %s8477_s30  ;;  %s8452_s30 = sld [smem:[#allocation7 + $0x3]] }
 0x1ae   : > { %9384 = vmatprep.subr.bf16.mxu1 %v9944_v5  ;;  %v3427_v1 = vand.u32 4294901760, %v3358_v0 }
 0x1b0   : > { %8864 = vmatmul.mubr.f32.vlgmr.msra.gmra.mrb[2].mxu1 %v1467_v24  ;;  %v3428_v2 = vsub.f32 %v3358_v0, %v3427_v1  ;;  %v6293_v0 = vadd.f32 %v6292_v62, %v6289_v61 }
 0x1b1   : > { %9386 = vmatpush3.bf16.msra.mxu1 %v10153_v38  ;;  %8870 = vmatprep.mubr.msk.f32.mxu1 %vm9945_vm0, %v9946_v8 }
 0x1b2   : > { %9387 = vmatprep.subr.bf16.mxu1 %v9944_v5  ;;  %v3429_v3 = vand.u32 4294901760, %v3428_v2 }
 0x1b4   : > { %v3430_v4 = vsub.f32 %v3428_v2, %v3429_v3 }
 0x1b6   : > { %v3431_v13 = vand.u32 4294901760, %v3430_v4  ;;  %v361_v4 = vlaneseq }
 0x1b8   : > { %8871 = vmatmul.mubr.f32.vlgmr.msra.gmra.mrb[2].mxu1 %v1463_v18  ;;  %v362_v7 = vshrl.u32 %v361_v4, 7  ;;  %v365_v14 = vand.u32 127, %v361_v4 }
 0x1b9   : > { %9389 = vmatpush3.bf16.msra.mxu1 %v10159_v40  ;;  %8877 = vmatprep.mubr.msk.f32.mxu1 %vm9945_vm0, %v9946_v8 }
 0x1ba   : > { %9390 = vmatprep.subr.bf16.mxu1 %v9944_v5  ;;  %v363_v15 = vadd.s32 8, %v362_v7  ;;  %vm382_vm3 = vcmp.eq.s32.totalorder %v365_v14, 0  ;;  %vm383_vm4 = vcmp.eq.s32.totalorder %v365_v14, 31  ;;  %vm366_vm7 = vcmp.eq.s32.totalorder %v362_v7, 0 }
 0x1bb   : > { %vm384_vm9 = vmor %vm382_vm3, %vm383_vm4 }
 0x1bc   : > { %vm374_vm5 = vcmp.eq.s32.totalorder %v363_v15, 15 }
 0x1c0   : > { %8878 = vmatmul.mubr.f32.vlgmr.msra.gmra.mrb[2].mxu1 %v1464_v19 }
 0x1c1   : > { %9392 = vmatpush3.bf16.msra.mxu1 %v10139_v9  ;;  %8884 = vmatprep.mubr.msk.f32.mxu1 %vm9945_vm0, %v9946_v8 }
 0x1c2   : > { %9393 = vmatprep.subr.bf16.mxu1 %v9944_v5 }
 0x1c8   : > { %8885 = vmatmul.mubr.f32.vlgmr.msra.gmra.mrb[2].mxu1 %v1465_v20  ;;  %v4335_v20 = vstv %s8460_s7  ;;  %s8485_s7 = sld [smem:[#allocation2 + $0x381]] }
 0x1c9   : > { %9395 = vmatpush3.bf16.msra.mxu1 %v10169_v41  ;;  %8891 = vmatprep.mubr.msk.f32.mxu1 %vm9945_vm0, %v9946_v8 }
 0x1ca   : > { %9396 = vmatprep.subr.bf16.mxu1 %v9944_v5 }
 0x1d0   : > { %8892 = vmatmul.mubr.f32.vlgmr.msra.gmra.mrb[2].mxu1 %v1463_v18 }
 0x1d1   : > { %9398 = vmatpush3.bf16.msra.mxu1 %v10139_v9  ;;  %8898 = vmatprep.mubr.msk.f32.mxu1 %vm9945_vm0, %v9946_v8 }
 0x1d2   : > { %9399 = vmatprep.subr.bf16.mxu1 %v9944_v5 }
 0x1d8   : > { %8899 = vmatmul.mubr.f32.vlgmr.msra.gmra.mrb[2].mxu1 %v1463_v18  ;;  %v4332_v18 = vmul.f32 %v10146_v12, %v4331_v16  ;;  %v376_v16 = vstv %s375_s8  ;;  %s8470_s8 = sld [smem:[#allocation7 + $0x5]] }
 0x1d9   : > { %9401 = vmatpush3.bf16.msra.mxu1 %v10139_v9  ;;  %8935 = vmatprep.mubr.msk.f32.mxu1 %vm9945_vm0, %v9946_v8  ;;  %vm377_vm6 = vcmp.eq.s32.totalorder %v376_v16, 1 }
 0x1da   : > { %9402 = vmatprep.subr.bf16.mxu1 %v9944_v5  ;;  %v4333_v19 = vadd.f32 %v4332_v18, %v4329_v17  ;;  %v369_v18 = vstv %s368_s10  ;;  %vm379_vm10 = vmand %vm374_vm5, %vm377_vm6  ;;  %s8479_s10 = sld [smem:[#allocation7 + $0x6]] }
 0x1db   : > { %vm370_vm8 = vcmp.eq.s32.totalorder %v369_v18, 1  ;;  %vm10369_vm12 = vmand %vm379_vm10, %vm384_vm9 }
 0x1dc   : > { %8936 = vmatmul.mubr.f32.vlgmr.msra.gmra.mrb[4].mxu1 %v2449_v49  ;;  %v4336_v21 = vadd.f32 %v4335_v20, %v4333_v19  ;;  %vm371_vm11 = vmand %vm366_vm7, %vm370_vm8 }
 0x1dd   : > { %9404 = vmatpush3.bf16.msra.mxu1 %v10153_v38  ;;  %8942 = vmatprep.mubr.msk.f32.mxu1 %vm9945_vm0, %v9946_v8  ;;  %vm10374_vm13 = vmand %vm371_vm11, %vm384_vm9 }
 0x1de   : > { %9405 = vmatprep.subr.bf16.mxu1 %v9944_v5  ;;  %v4337_v22 = vmax.f32 %v4336_v21, 0.0 }
 0x1e0   : > { %v4338_v23 = vmin.f32 %v4337_v22, 6.0  ;;  %v1363_v22 = vstv %s1362_s1  ;;  %s8488_s1 = sld [smem:[#allocation7 + $0x7]] }
 0x1e2   : > { %v4340_v24 = vsel %vm403_vm1, %v4338_v23, 0 }
 0x1e3   : > { %v4409_v25 = vand.u32 4294901760, %v4340_v24 }
 0x1e4   : > { %8943 = vmatmul.mubr.f32.vlgmr.msra.gmra.mrb[4].mxu1 %v2445_v36 }
 0x1e5   : > { %9407 = vmatpush3.bf16.msra.mxu1 %v10159_v40  ;;  %8949 = vmatprep.mubr.msk.f32.mxu1 %vm9945_vm0, %v9946_v8  ;;  %v4410_v26 = vsub.f32 %v4340_v24, %v4409_v25 }
 0x1e6   : > { %9408 = vmatprep.subr.bf16.mxu1 %v9944_v5 }
 0x1e7   : > { %v4411_v27 = vand.u32 4294901760, %v4410_v26 }
 0x1e9   : > { %v4412_v28 = vsub.f32 %v4410_v26, %v4411_v27 }
 0x1eb   : > { %v4413_v31 = vand.u32 4294901760, %v4412_v28 }
 0x1ec   : > { %8950 = vmatmul.mubr.f32.vlgmr.msra.gmra.mrb[4].mxu1 %v2446_v37 }
 0x1ed   : > { %9410 = vmatpush3.bf16.msra.mxu1 %v10139_v9  ;;  %8956 = vmatprep.mubr.msk.f32.mxu1 %vm9945_vm0, %v9946_v8 }
 0x1ee   : > { %9411 = vmatprep.subr.bf16.mxu1 %v9944_v5 }
 0x1f4   : > { %8957 = vmatmul.mubr.f32.vlgmr.msra.gmra.mrb[4].mxu1 %v2447_v39  ;;  %v5317_v39 = vstv %s8469_s15  ;;  %s10401_s15 = scalar_lea.vmem [#allocation9], %s8423_s14 }
 0x1f5   : > { %9413 = vmatpush3.bf16.msra.mxu1 %v10169_v41  ;;  %8963 = vmatprep.mubr.msk.f32.mxu1 %vm9945_vm0, %v9946_v8 }
 0x1f6   : > { %9414 = vmatprep.subr.bf16.mxu1 %v9944_v5 }
 0x1fc   : > { %8964 = vmatmul.mubr.f32.vlgmr.msra.gmra.mrb[4].mxu1 %v2445_v36 }
 0x1fd   : > { %9416 = vmatpush3.bf16.msra.mxu1 %v10139_v9  ;;  %8970 = vmatprep.mubr.msk.f32.mxu1 %vm9945_vm0, %v9946_v8 }
 0x1fe   : > { %9417 = vmatprep.subr.bf16.mxu1 %v9944_v5 }
 0x204   : > { %8971 = vmatmul.mubr.f32.vlgmr.msra.gmra.mrb[4].mxu1 %v2445_v36  ;;  %v5314_v36 = vmul.f32 %v10146_v12, %v5313_v34 }
 0x205   : > { %9419 = vmatpush3.bf16.msra.mxu1 %v10139_v9  ;;  %9007 = vmatprep.mubr.msk.f32.mxu1 %vm9945_vm0, %v9946_v8 }
 0x206   : > { %9420 = vmatprep.subr.bf16.mxu1 %v9944_v5  ;;  %v5315_v37 = vadd.f32 %v5314_v36, %v5311_v35  ;;  %v7270_v35 = vstv %s8484_s16  ;;  %v7273_v36 = vstv %s8485_s7  ;;  %s8252_s16 = scalar_lea.sflag [#allocation3], %s10127_s11 }
 0x208   : > { %9008 = vmatmul.mubr.f32.vlgmr.msra.gmra.mrb[6].mxu1 %v3431_v13  ;;  %v5318_v42 = vadd.f32 %v5317_v39, %v5315_v37  ;;  %v7271_v39 = vmul.f32 %v7270_v35, %v10142_v10 }
 0x209   : > { %9422 = vmatpush3.bf16.msra.mxu1 %v10153_v38  ;;  %9014 = vmatprep.mubr.msk.f32.mxu1 %vm9945_vm0, %v9946_v8 }
 0x20a   : > { %9423 = vmatprep.subr.bf16.mxu1 %v9944_v5  ;;  %v5319_v43 = vmax.f32 %v5318_v42, 0.0  ;;  %v7274_v42 = vmul.f32 %v10144_v11, %v7273_v36  ;;  %v7281_v11 = vstv %s8487_s17 }
 0x20c   : > { %v5320_v47 = vmin.f32 %v5319_v43, 6.0  ;;  %v7277_v43 = vstv %s8486_s9 }
 0x20e   : > { %v5322_v49 = vsel %vm403_vm1, %v5320_v47, 0 }
 0x20f   : > { %v10330_v50 = vand.u32 4294901760, %v5322_v49 }
 0x210   : > { %9015 = vmatmul.mubr.f32.vlgmr.msra.gmra.mrb[6].mxu1 %v3427_v1 }
 0x211   : > { %9425 = vmatpush3.bf16.msra.mxu1 %v10159_v40  ;;  %9021 = vmatprep.mubr.msk.f32.mxu1 %vm9945_vm0, %v9946_v8  ;;  %v5392_v54 = vsub.f32 %v5322_v49, %v10330_v50  ;;  %v7275_v49 = vadd.f32 %v7274_v42, %v7271_v39 }
 0x212   : > { %9426 = vmatprep.subr.bf16.mxu1 %v9944_v5 }
 0x213   : > { %v5393_v55 = vand.u32 4294901760, %v5392_v54 }
 0x215   : > { %v5394_v56 = vsub.f32 %v5392_v54, %v5393_v55 }
 0x217   : > { %v5395_v59 = vand.u32 4294901760, %v5394_v56 }
 0x218   : > { %9022 = vmatmul.mubr.f32.vlgmr.msra.gmra.mrb[6].mxu1 %v3428_v2 }
 0x219   : > { %9428 = vmatpush3.bf16.msra.mxu1 %v10139_v9  ;;  %9028 = vmatprep.mubr.msk.f32.mxu1 %vm9945_vm0, %v9946_v8 }
 0x21a   : > { %9429 = vmatprep.subr.bf16.mxu1 %v9944_v5 }
 0x220   : > { %9029 = vmatmul.mubr.f32.vlgmr.msra.gmra.mrb[6].mxu1 %v3429_v3  ;;  %v6299_v3 = vstv %s8478_s29  ;;  %s8461_s29 = sld [smem:[#allocation7 + $0x4]] }
 0x221   : > { %9431 = vmatpush3.bf16.msra.mxu1 %v10169_v41  ;;  %9035 = vmatprep.mubr.msk.f32.mxu1 %vm9945_vm0, %v9946_v8 }
 0x222   : > { %9432 = vmatprep.subr.bf16.mxu1 %v9944_v5 }
 0x228   : > { %9036 = vmatmul.mubr.f32.vlgmr.msra.gmra.mrb[6].mxu1 %v3427_v1 }
 0x229   : > { %9434 = vmatpush3.bf16.msra.mxu1 %v10139_v9  ;;  %9042 = vmatprep.mubr.msk.f32.mxu1 %vm9945_vm0, %v9946_v8 }
 0x22a   : > { %9435 = vmatprep.subr.bf16.mxu1 %v9944_v5 }
 0x230   : > { %9043 = vmatmul.mubr.f32.vlgmr.msra.gmra.mrb[6].mxu1 %v3427_v1  ;;  %v6296_v1 = vmul.f32 %v10146_v12, %v6295_v63 }
 0x231   : > { %9437 = vmatpush3.bf16.msra.mxu1 %v10139_v9  ;;  %9079 = vmatprep.mubr.msk.f32.mxu1 %vm9945_vm0, %v9946_v8 }
 0x232   : > { %9438 = vmatprep.subr.bf16.mxu1 %v9944_v5  ;;  %v6297_v2 = vadd.f32 %v6296_v1, %v6293_v0 }
 0x234   : > { %9080 = vmatmul.mubr.f32.vlgmr.msra.gmra.mrb[8].mxu1 %v4413_v31  ;;  %v6300_v6 = vadd.f32 %v6299_v3, %v6297_v2 }
 0x235   : > { %9440 = vmatpush3.bf16.msra.mxu1 %v10153_v38  ;;  %9086 = vmatprep.mubr.msk.f32.mxu1 %vm9945_vm0, %v9946_v8 }
 0x236   : > { %9441 = vmatprep.subr.bf16.mxu1 %v9944_v5  ;;  %v6301_v13 = vmax.f32 %v6300_v6, 0.0 }
 0x238   : > { %v6302_v17 = vmin.f32 %v6301_v13, 6.0 }
 0x23a   : > { %v6304_v19 = vsel %vm403_vm1, %v6302_v17, 0 }
 0x23b   : > { %v10364_v20 = vand.u32 4294901760, %v6304_v19 }
 0x23c   : > { %9087 = vmatmul.mubr.f32.vlgmr.msra.gmra.mrb[8].mxu1 %v4409_v25 }
 0x23d   : > { %9443 = vmatpush3.bf16.msra.mxu1 %v10159_v40  ;;  %9093 = vmatprep.mubr.msk.f32.mxu1 %vm9945_vm0, %v9946_v8  ;;  %v6374_v24 = vsub.f32 %v6304_v19, %v10364_v20 }
 0x23e   : > { %9444 = vmatprep.subr.bf16.mxu1 %v9944_v5 }
 0x23f   : > { %v6375_v30 = vand.u32 4294901760, %v6374_v24 }
 0x241   : > { %v6376_v34 = vsub.f32 %v6374_v24, %v6375_v30 }
 0x243   : > { %v6377_v37 = vand.u32 4294901760, %v6376_v34 }
 0x244   : > { %9094 = vmatmul.mubr.f32.vlgmr.msra.gmra.mrb[8].mxu1 %v4410_v26  ;;  %v1364_v26 = vsel %vm10374_vm13, -1.0, %v1363_v22 }
 0x245   : > { %9446 = vmatpush3.bf16.msra.mxu1 %v10139_v9  ;;  %9100 = vmatprep.mubr.msk.f32.mxu1 %vm9945_vm0, %v9946_v8 }
 0x246   : > { %9447 = vmatprep.subr.bf16.mxu1 %v9944_v5 }
 0x24c   : > { %9101 = vmatmul.mubr.f32.vlgmr.msra.gmra.mrb[8].mxu1 %v4411_v27 }
 0x24d   : > { %9449 = vmatpush3.bf16.msra.mxu1 %v10169_v41  ;;  %9107 = vmatprep.mubr.msk.f32.mxu1 %vm9945_vm0, %v9946_v8 }
 0x24e   : > { %9450 = vmatprep.subr.bf16.mxu1 %v9944_v5 }
 0x254   : > { %9108 = vmatmul.mubr.f32.vlgmr.msra.gmra.mrb[8].mxu1 %v4409_v25 }
 0x255   : > { %9452 = vmatpush3.bf16.msra.mxu1 %v10139_v9  ;;  %9114 = vmatprep.mubr.msk.f32.mxu1 %vm9945_vm0, %v9946_v8 }
 0x256   : > { %9453 = vmatprep.subr.bf16.mxu1 %v9944_v5 }
 0x25c   : > { %9115 = vmatmul.mubr.f32.vlgmr.msra.gmra.mrb[8].mxu1 %v4409_v25  ;;  %v1365_v25 = vsel %vm10369_vm12, -1.0, %v1363_v22 }
 0x25d   : > { %9455 = vmatpush3.bf16.msra.mxu1 %v10139_v9  ;;  %9151 = vmatprep.mubr.msk.f32.mxu1 %vm9945_vm0, %v9946_v8 }
 0x25e   : > { %9456 = vmatprep.subr.bf16.mxu1 %v9944_v5 }
 0x260   : > { %9152 = vmatmul.mubr.f32.vlgmr.msra.gmra.mrb[10].mxu1 %v5395_v59 }
 0x261   : > { %9458 = vmatpush3.bf16.msra.mxu1 %v10153_v38  ;;  %9158 = vmatprep.mubr.msk.f32.mxu1 %vm9945_vm0, %v9946_v8 }
 0x262   : > { %9459 = vmatprep.subr.bf16.mxu1 %v9944_v5 }
 0x268   : > { %9159 = vmatmul.mubr.f32.vlgmr.msra.gmra.mrb[10].mxu1 %v10330_v50 }
 0x269   : > { %9461 = vmatpush3.bf16.msra.mxu1 %v10159_v40  ;;  %9165 = vmatprep.mubr.msk.f32.mxu1 %vm9945_vm0, %v9946_v8 }
 0x26a   : > { %9462 = vmatprep.subr.bf16.mxu1 %v9944_v5 }
 0x270   : > { %9166 = vmatmul.mubr.f32.vlgmr.msra.gmra.mrb[10].mxu1 %v5392_v54 }
 0x271   : > { %9464 = vmatpush3.bf16.msra.mxu1 %v10139_v9  ;;  %9172 = vmatprep.mubr.msk.f32.mxu1 %vm9945_vm0, %v9946_v8 }
 0x272   : > { %9465 = vmatprep.subr.bf16.mxu1 %v9944_v5 }
 0x278   : > { %9173 = vmatmul.mubr.f32.vlgmr.msra.gmra.mrb[10].mxu1 %v5393_v55 }
 0x279   : > { %9467 = vmatpush3.bf16.msra.mxu1 %v10169_v41  ;;  %9179 = vmatprep.mubr.msk.f32.mxu1 %vm9945_vm0, %v9946_v8 }
 0x27a   : > { %9468 = vmatprep.subr.bf16.mxu1 %v9944_v5 }
 0x27f   : > { %v8858_v27 = vpop.f32.mrb[0].mxu1 }
 0x280   : > { %v1367_v28 = vmax.f32 %v8858_v27, %v1365_v25  ;;  %v1352_v29 = vpop.f32.mrb[1].mxu1  ;;  %9180 = vmatmul.mubr.f32.vlgmr.msra.gmra.mrb[10].mxu1 %v10330_v50 }
 0x281   : > { %v1366_v31 = vmax.f32 %v1352_v29, %v1364_v26  ;;  %9470 = vmatpush3.bf16.msra.mxu1 %v10139_v9  ;;  %9186 = vmatprep.mubr.msk.f32.mxu1 %vm9945_vm0, %v9946_v8 }
 0x282   : > { %v8429_v32 = vclamps-f32 %v1367_v28, 0.9  ;;  %9471 = vmatprep.subr.bf16.mxu1 %v9944_v5 }
 0x283   : > { %v8428_v33 = vclamps-f32 %v1366_v31, 0.9 }
 0x284   : > { %9788 = vtanh.f32 %v8429_v32 }
 0x285   : > { %9790 = vtanh.f32 %v8428_v33 }
 0x288   : > { %9187 = vmatmul.mubr.f32.vlgmr.msra.gmra.mrb[10].mxu1 %v10330_v50  ;;  %v7278_v50 = vmul.f32 %v10146_v12, %v7277_v43 }
 0x289   : > { %9473 = vmatpush3.bf16.msra.mxu1 %v10139_v9  ;;  %9223 = vmatprep.mubr.msk.f32.mxu1 %vm9945_vm0, %v9946_v8 }
 0x28a   : > { %9474 = vmatprep.subr.bf16.mxu1 %v9944_v5  ;;  %v7279_v10 = vadd.f32 %v7278_v50, %v7275_v49 }
 0x28c   : > { %9224 = vmatmul.mubr.f32.vlgmr.msra.gmra.mrb[12].mxu1 %v6377_v37  ;;  %v7282_v12 = vadd.f32 %v7281_v11, %v7279_v10 }
 0x28d   : > { %9476 = vmatpush3.bf16.msra.mxu1 %v10153_v38  ;;  %9230 = vmatprep.mubr.msk.f32.mxu1 %vm9945_vm0, %v9946_v8 }
 0x28e   : > { %v9789_v47 = vpop.eup %9788  ;;  %9477 = vmatprep.subr.bf16.mxu1 %v9944_v5  ;;  %v7283_v55 = vmax.f32 %v7282_v12, 0.0 }
 0x28f   : > { %v9791_v54 = vpop.eup %9790  ;;  %1376 = vst.msk [vmem:[%s10401_s15 + $0x8] sm:$0xff] %vm1374_vm14, %v9789_v47 }
 0x290   : > { %1375 = vst.msk [vmem:[%s10401_s15] sm:$0xff] %vm1374_vm14, %v9791_v54  ;;  %v7284_v56 = vmin.f32 %v7283_v55, 6.0  ;;  %v2345_v54 = vstv %s8434_s19 }
 0x291   : > { %v2347_v10 = vsel %vm10369_vm12, -1.0, %v2345_v54  ;;  %v2346_v11 = vsel %vm10374_vm13, -1.0, %v2345_v54  ;;  %v7255_v54 = vstv %s8479_s10 }
 0x292   : > { %v7286_v57 = vsel %vm403_vm1, %v7284_v56, 0 }
 0x293   : > { %v10420_v58 = vand.u32 4294901760, %v7286_v57 }
 0x294   : > { %9231 = vmatmul.mubr.f32.vlgmr.msra.gmra.mrb[12].mxu1 %v10364_v20 }
 0x295   : > { %9479 = vmatpush3.bf16.msra.mxu1 %v10159_v40  ;;  %9237 = vmatprep.mubr.msk.f32.mxu1 %vm9945_vm0, %v9946_v8  ;;  %v7356_v59 = vsub.f32 %v7286_v57, %v10420_v58 }
 0x296   : > { %9480 = vmatprep.subr.bf16.mxu1 %v9944_v5 }
 0x297   : > { %v7357_v0 = vand.u32 4294901760, %v7356_v59 }
 0x299   : > { %v7358_v3 = vsub.f32 %v7356_v59, %v7357_v0 }
 0x29b   : > { %v7359_v7 = vand.u32 4294901760, %v7358_v3 }
 0x29c   : > { %9238 = vmatmul.mubr.f32.vlgmr.msra.gmra.mrb[12].mxu1 %v6374_v24 }
 0x29d   : > { %9482 = vmatpush3.bf16.msra.mxu1 %v10139_v9  ;;  %9244 = vmatprep.mubr.msk.f32.mxu1 %vm9945_vm0, %v9946_v8 }
 0x29e   : > { %9483 = vmatprep.subr.bf16.mxu1 %v9944_v5 }
 0x2a4   : > { %9245 = vmatmul.mubr.f32.vlgmr.msra.gmra.mrb[12].mxu1 %v6375_v30 }
 0x2a5   : > { %9485 = vmatpush3.bf16.msra.mxu1 %v10169_v41  ;;  %9251 = vmatprep.mubr.msk.f32.mxu1 %vm9945_vm0, %v9946_v8 }
 0x2a6   : > { %9486 = vmatprep.subr.bf16.mxu1 %v9944_v5 }
 0x2ab   : > { %v1851_v61 = vpop.f32.mrb[2].mxu1 }
 0x2ac   : > { %v1856_v62 = vand.u32 4294901760, %v1851_v61  ;;  %v8900_v63 = vpop.f32.mrb[3].mxu1  ;;  %9252 = vmatmul.mubr.f32.vlgmr.msra.gmra.mrb[12].mxu1 %v10364_v20 }
 0x2ad   : > { %9488 = vmatpush3.bf16.msra.mxu1 %v10139_v9  ;;  %9258 = vmatprep.mubr.msk.f32.mxu1 %vm9945_vm0, %v9946_v8 }
 0x2ae   : > { %v1943_v1 = vsub.f32 %v1851_v61, %v1856_v62  ;;  %8901 = vmatprep.subr.mxu0 %v1856_v62  ;;  %9489 = vmatprep.subr.bf16.mxu1 %v9944_v5 }
 0x2af   : > { %8902 = vmatpush3.msra.mxu0 %v1856_v62 }
 0x2b0   : > { %8904 = vmatmul.mubr.f32.vlgmr.msra.gmra.mrb[2].mxu0 %v10208_v60  ;;  %v1944_v2 = vand.u32 4294901760, %v1943_v1 }
 0x2b1   : > { %8908 = vmatprep.mubr.f32.mxu0 %v10181_v44 }
 0x2b2   : > { %v1945_v4 = vsub.f32 %v1943_v1, %v1944_v2 }
 0x2b4   : > { %9259 = vmatmul.mubr.f32.vlgmr.msra.gmra.mrb[12].mxu1 %v10364_v20  ;;  %v1946_v6 = vand.u32 4294901760, %v1945_v4 }
 0x2b5   : > { %9491 = vmatpush3.bf16.msra.mxu1 %v10139_v9  ;;  %9295 = vmatprep.mubr.msk.f32.mxu1 %vm9945_vm0, %v9946_v8 }
 0x2b6   : > { %8906 = vmatprep.subr.mxu0 %v1946_v6  ;;  %9492 = vmatprep.subr.bf16.mxu1 %v9944_v5 }
 0x2b7   : > { %8907 = vmatpush3.msra.mxu0 %v1946_v6 }
 0x2b8   : > { %8909 = vmatmul.mubr.f32.vlgmr.msra.gmra.mrb[2].mxu0 %v10198_v51  ;;  %8911 = vmatprep.subr.mxu0 %v1943_v1 }
 0x2b9   : > { %9296 = vmatmul.mubr.f32.vlgmr.msra.gmra.mrb[14].mxu1 %v7359_v7  ;;  %8912 = vmatpush3.msra.mxu0 %v1943_v1 }
 0x2ba   : > { %8916 = vmatprep.subr.mxu0 %v1856_v62  ;;  %9494 = vmatpush3.bf16.msra.mxu1 %v10153_v38 }
 0x2bb   : > { %8913 = vmatprep.mubr.f32.mxu0 %v10184_v45  ;;  %9302 = vmatprep.mubr.msk.f32.mxu1 %vm9945_vm0, %v9946_v8 }
 0x2bc   : > { %9495 = vmatprep.subr.bf16.mxu1 %v9944_v5 }
 0x2c0   : > { %8914 = vmatmul.mubr.f32.vlgmr.msra.gmra.mrb[2].mxu0 %v10201_v52 }
 0x2c1   : > { %8917 = vmatpush3.msra.mxu0 %v1856_v62  ;;  %9303 = vmatmul.mubr.f32.vlgmr.msra.gmra.mrb[14].mxu1 %v10420_v58 }
 0x2c2   : > { %8921 = vmatprep.subr.mxu0 %v1944_v2  ;;  %9497 = vmatpush3.bf16.msra.mxu1 %v10159_v40 }
 0x2c3   : > { %8918 = vmatprep.mubr.f32.mxu0 %v10187_v46  ;;  %9309 = vmatprep.mubr.msk.f32.mxu1 %vm9945_vm0, %v9946_v8 }
 0x2c4   : > { %9498 = vmatprep.subr.bf16.mxu1 %v9944_v5 }
 0x2c8   : > { %8919 = vmatmul.mubr.f32.vlgmr.msra.gmra.mrb[2].mxu0 %v10204_v53 }
 0x2c9   : > { %8922 = vmatpush3.msra.mxu0 %v1944_v2  ;;  %9310 = vmatmul.mubr.f32.vlgmr.msra.gmra.mrb[14].mxu1 %v7356_v59 }
 0x2ca   : > { %8926 = vmatprep.subr.mxu0 %v1856_v62  ;;  %9500 = vmatpush3.bf16.msra.mxu1 %v10139_v9 }
 0x2cb   : > { %8923 = vmatprep.mubr.f32.mxu0 %v10181_v44  ;;  %9316 = vmatprep.mubr.msk.f32.mxu1 %vm9945_vm0, %v9946_v8 }
 0x2cc   : > { %9501 = vmatprep.subr.bf16.mxu1 %v9944_v5 }
 0x2d0   : > { %8924 = vmatmul.mubr.f32.vlgmr.msra.gmra.mrb[2].mxu0 %v10198_v51 }
 0x2d1   : > { %8927 = vmatpush3.msra.mxu0 %v1856_v62  ;;  %9317 = vmatmul.mubr.f32.vlgmr.msra.gmra.mrb[14].mxu1 %v7357_v0 }
 0x2d2   : > { %9503 = vmatpush3.bf16.msra.mxu1 %v10169_v41  ;;  %8928 = vmatprep.mubr.f32.mxu0 %v10181_v44 }
 0x2d3   : > { %9323 = vmatprep.mubr.msk.f32.mxu1 %vm9945_vm0, %v9946_v8  ;;  %9504 = vmatprep.subr.bf16.mxu1 %v9944_v5 }
 0x2d7   : > { %v2833_v38 = vpop.f32.mrb[4].mxu1 }
 0x2d8   : > { %v2838_v40 = vand.u32 4294901760, %v2833_v38  ;;  %8929 = vmatmul.mubr.f32.vlgmr.msra.gmra.mrb[2].mxu0 %v10198_v51  ;;  %v8972_v13 = vpop.f32.mrb[5].mxu1 }
 0x2d9   : > { %9324 = vmatmul.mubr.f32.vlgmr.msra.gmra.mrb[14].mxu1 %v10420_v58  ;;  %8975 = vmatprep.mubr.f32.mxu0 %v10191_v48 }
 0x2da   : > { %v2925_v14 = vsub.f32 %v2833_v38, %v2838_v40  ;;  %8973 = vmatprep.subr.mxu0 %v2838_v40  ;;  %9506 = vmatpush3.bf16.msra.mxu1 %v10139_v9 }
 0x2db   : > { %8974 = vmatpush3.msra.mxu0 %v2838_v40  ;;  %9330 = vmatprep.mubr.msk.f32.mxu1 %vm9945_vm0, %v9946_v8 }
 0x2dc   : > { %8976 = vmatmul.mubr.f32.vlgmr.msra.gmra.mrb[4].mxu0 %v10208_v60  ;;  %v2926_v5 = vand.u32 4294901760, %v2925_v14 }
 0x2dd   : > { %8980 = vmatprep.mubr.f32.mxu0 %v10181_v44 }
 0x2de   : > { %v2927_v41 = vsub.f32 %v2925_v14, %v2926_v5 }
 0x2e0   : > { %v2928_v15 = vand.u32 4294901760, %v2927_v41 }
 0x2e1   : > { %9331 = vmatmul.mubr.f32.vlgmr.msra.gmra.mrb[14].mxu1 %v10420_v58 }
 0x2e2   : > { %8978 = vmatprep.subr.mxu0 %v2928_v15 }
 0x2e3   : > { %8979 = vmatpush3.msra.mxu0 %v2928_v15 }
 0x2e4   : > { %8981 = vmatmul.mubr.f32.vlgmr.msra.gmra.mrb[4].mxu0 %v10198_v51  ;;  %8983 = vmatprep.subr.mxu0 %v2925_v14 }
 0x2e5   : > { %8984 = vmatpush3.msra.mxu0 %v2925_v14  ;;  %8985 = vmatprep.mubr.f32.mxu0 %v10184_v45 }
 0x2e6   : > { %8988 = vmatprep.subr.mxu0 %v2838_v40 }
 0x2ec   : > { %8986 = vmatmul.mubr.f32.vlgmr.msra.gmra.mrb[4].mxu0 %v10201_v52 }
 0x2ed   : > { %8989 = vmatpush3.msra.mxu0 %v2838_v40  ;;  %8990 = vmatprep.mubr.f32.mxu0 %v10187_v46 }
 0x2ee   : > { %8993 = vmatprep.subr.mxu0 %v2926_v5 }
 0x2f4   : > { %8991 = vmatmul.mubr.f32.vlgmr.msra.gmra.mrb[4].mxu0 %v10204_v53 }
 0x2f5   : > { %8994 = vmatpush3.msra.mxu0 %v2926_v5  ;;  %8995 = vmatprep.mubr.f32.mxu0 %v10181_v44  ;;  %v4309_v5 = vstv %s8452_s30 }
 0x2f6   : > { %8998 = vmatprep.subr.mxu0 %v2838_v40  ;;  %v4311_v41 = vsel %vm10369_vm12, -1.0, %v4309_v5 }
 0x2fc   : > { %8996 = vmatmul.mubr.f32.vlgmr.msra.gmra.mrb[4].mxu0 %v10198_v51 }
 0x2fd   : > { %8999 = vmatpush3.msra.mxu0 %v2838_v40  ;;  %9000 = vmatprep.mubr.f32.mxu0 %v10181_v44 }
 0x303   : > { %v3815_v8 = vpop.f32.mrb[6].mxu1 }
 0x304   : > { %v3820_v9 = vand.u32 4294901760, %v3815_v8  ;;  %9001 = vmatmul.mubr.f32.vlgmr.msra.gmra.mrb[4].mxu0 %v10198_v51  ;;  %v9044_v16 = vpop.f32.mrb[7].mxu1 }
 0x305   : > { %9047 = vmatprep.mubr.f32.mxu0 %v10191_v48 }
 0x306   : > { %v3907_v17 = vsub.f32 %v3815_v8, %v3820_v9  ;;  %9045 = vmatprep.subr.mxu0 %v3820_v9 }
 0x307   : > { %9046 = vmatpush3.msra.mxu0 %v3820_v9 }
 0x308   : > { %9048 = vmatmul.mubr.f32.vlgmr.msra.gmra.mrb[6].mxu0 %v10208_v60  ;;  %v3908_v18 = vand.u32 4294901760, %v3907_v17 }
 0x309   : > { %9052 = vmatprep.mubr.f32.mxu0 %v10181_v44 }
 0x30a   : > { %v3909_v19 = vsub.f32 %v3907_v17, %v3908_v18 }
 0x30c   : > { %v3910_v20 = vand.u32 4294901760, %v3909_v19 }
 0x30e   : > { %9050 = vmatprep.subr.mxu0 %v3910_v20 }
 0x30f   : > { %9051 = vmatpush3.msra.mxu0 %v3910_v20  ;;  %v5291_v20 = vstv %s8461_s29 }
 0x310   : > { %9053 = vmatmul.mubr.f32.vlgmr.msra.gmra.mrb[6].mxu0 %v10198_v51  ;;  %9055 = vmatprep.subr.mxu0 %v3907_v17 }
 0x311   : > { %9056 = vmatpush3.msra.mxu0 %v3907_v17  ;;  %9057 = vmatprep.mubr.f32.mxu0 %v10184_v45 }
 0x312   : > { %9060 = vmatprep.subr.mxu0 %v3820_v9 }
 0x318   : > { %9058 = vmatmul.mubr.f32.vlgmr.msra.gmra.mrb[6].mxu0 %v10201_v52 }
 0x319   : > { %9061 = vmatpush3.msra.mxu0 %v3820_v9  ;;  %9062 = vmatprep.mubr.f32.mxu0 %v10187_v46 }
 0x31a   : > { %9065 = vmatprep.subr.mxu0 %v3908_v18 }
 0x320   : > { %9063 = vmatmul.mubr.f32.vlgmr.msra.gmra.mrb[6].mxu0 %v10204_v53 }
 0x321   : > { %9066 = vmatpush3.msra.mxu0 %v3908_v18  ;;  %9067 = vmatprep.mubr.f32.mxu0 %v10181_v44 }
 0x322   : > { %9070 = vmatprep.subr.mxu0 %v3820_v9 }
 0x328   : > { %9068 = vmatmul.mubr.f32.vlgmr.msra.gmra.mrb[6].mxu0 %v10198_v51 }
 0x329   : > { %9071 = vmatpush3.msra.mxu0 %v3820_v9  ;;  %9072 = vmatprep.mubr.f32.mxu0 %v10181_v44 }
 0x32f   : > { %v4797_v22 = vpop.f32.mrb[8].mxu1 }
 0x330   : > { %v4802_v24 = vand.u32 4294901760, %v4797_v22  ;;  %9073 = vmatmul.mubr.f32.vlgmr.msra.gmra.mrb[6].mxu0 %v10198_v51  ;;  %v9116_v25 = vpop.f32.mrb[9].mxu1 }
 0x331   : > { %9119 = vmatprep.mubr.f32.mxu0 %v10191_v48 }
 0x332   : > { %v4889_v26 = vsub.f32 %v4797_v22, %v4802_v24  ;;  %9117 = vmatprep.subr.mxu0 %v4802_v24  ;;  %v5293_v22 = vsel %vm10369_vm12, -1.0, %v5291_v20 }
 0x333   : > { %9118 = vmatpush3.msra.mxu0 %v4802_v24 }
 0x334   : > { %9120 = vmatmul.mubr.f32.vlgmr.msra.gmra.mrb[8].mxu0 %v10208_v60  ;;  %v4890_v27 = vand.u32 4294901760, %v4889_v26 }
 0x335   : > { %9124 = vmatprep.mubr.f32.mxu0 %v10181_v44 }
 0x336   : > { %v4891_v28 = vsub.f32 %v4889_v26, %v4890_v27 }
 0x338   : > { %v4892_v29 = vand.u32 4294901760, %v4891_v28 }
 0x33a   : > { %9122 = vmatprep.subr.mxu0 %v4892_v29 }
 0x33b   : > { %9123 = vmatpush3.msra.mxu0 %v4892_v29 }
 0x33c   : > { %9125 = vmatmul.mubr.f32.vlgmr.msra.gmra.mrb[8].mxu0 %v10198_v51  ;;  %9127 = vmatprep.subr.mxu0 %v4889_v26 }
 0x33d   : > { %9128 = vmatpush3.msra.mxu0 %v4889_v26  ;;  %9129 = vmatprep.mubr.f32.mxu0 %v10184_v45 }
 0x33e   : > { %9132 = vmatprep.subr.mxu0 %v4802_v24 }
 0x344   : > { %9130 = vmatmul.mubr.f32.vlgmr.msra.gmra.mrb[8].mxu0 %v10201_v52 }
 0x345   : > { %9133 = vmatpush3.msra.mxu0 %v4802_v24  ;;  %9134 = vmatprep.mubr.f32.mxu0 %v10187_v46 }
 0x346   : > { %9137 = vmatprep.subr.mxu0 %v4890_v27 }
 0x34c   : > { %9135 = vmatmul.mubr.f32.vlgmr.msra.gmra.mrb[8].mxu0 %v10204_v53 }
 0x34d   : > { %9138 = vmatpush3.msra.mxu0 %v4890_v27  ;;  %9139 = vmatprep.mubr.f32.mxu0 %v10181_v44 }
 0x34e   : > { %9142 = vmatprep.subr.mxu0 %v4802_v24 }
 0x354   : > { %9140 = vmatmul.mubr.f32.vlgmr.msra.gmra.mrb[8].mxu0 %v10198_v51 }
 0x355   : > { %9143 = vmatpush3.msra.mxu0 %v4802_v24  ;;  %9144 = vmatprep.mubr.f32.mxu0 %v10181_v44  ;;  %v5292_v24 = vsel %vm10374_vm13, -1.0, %v5291_v20 }
 0x35b   : > { %v5779_v30 = vpop.f32.mrb[10].mxu1 }
 0x35c   : > { %v5784_v31 = vand.u32 4294901760, %v5779_v30  ;;  %9145 = vmatmul.mubr.f32.vlgmr.msra.gmra.mrb[8].mxu0 %v10198_v51  ;;  %v9188_v32 = vpop.f32.mrb[11].mxu1 }
 0x35d   : > { %9191 = vmatprep.mubr.f32.mxu0 %v10191_v48 }
 0x35e   : > { %v5871_v33 = vsub.f32 %v5779_v30, %v5784_v31  ;;  %9189 = vmatprep.subr.mxu0 %v5784_v31 }
 0x35f   : > { %9190 = vmatpush3.msra.mxu0 %v5784_v31 }
 0x360   : > { %9192 = vmatmul.mubr.f32.vlgmr.msra.gmra.mrb[10].mxu0 %v10208_v60  ;;  %v5872_v34 = vand.u32 4294901760, %v5871_v33 }
 0x361   : > { %9196 = vmatprep.mubr.f32.mxu0 %v10181_v44 }
 0x362   : > { %v5873_v35 = vsub.f32 %v5871_v33, %v5872_v34 }
 0x364   : > { %v5874_v36 = vand.u32 4294901760, %v5873_v35 }
 0x366   : > { %9194 = vmatprep.subr.mxu0 %v5874_v36 }
 0x367   : > { %9195 = vmatpush3.msra.mxu0 %v5874_v36 }
 0x368   : > { %9197 = vmatmul.mubr.f32.vlgmr.msra.gmra.mrb[10].mxu0 %v10198_v51  ;;  %9199 = vmatprep.subr.mxu0 %v5871_v33 }
 0x369   : > { %9200 = vmatpush3.msra.mxu0 %v5871_v33  ;;  %9201 = vmatprep.mubr.f32.mxu0 %v10184_v45  ;;  %v6273_v33 = vstv %s8470_s8 }
 0x36a   : > { %9204 = vmatprep.subr.mxu0 %v5784_v31  ;;  %v6274_v35 = vsel %vm10374_vm13, -1.0, %v6273_v33 }
 0x370   : > { %9202 = vmatmul.mubr.f32.vlgmr.msra.gmra.mrb[10].mxu0 %v10201_v52 }
 0x371   : > { %9205 = vmatpush3.msra.mxu0 %v5784_v31  ;;  %9206 = vmatprep.mubr.f32.mxu0 %v10187_v46 }
 0x372   : > { %9209 = vmatprep.subr.mxu0 %v5872_v34 }
 0x378   : > { %9207 = vmatmul.mubr.f32.vlgmr.msra.gmra.mrb[10].mxu0 %v10204_v53 }
 0x379   : > { %9210 = vmatpush3.msra.mxu0 %v5872_v34  ;;  %9211 = vmatprep.mubr.f32.mxu0 %v10181_v44  ;;  %v6275_v34 = vsel %vm10369_vm12, -1.0, %v6273_v33 }
 0x37a   : > { %9214 = vmatprep.subr.mxu0 %v5784_v31 }
 0x380   : > { %9212 = vmatmul.mubr.f32.vlgmr.msra.gmra.mrb[10].mxu0 %v10198_v51 }
 0x381   : > { %9215 = vmatpush3.msra.mxu0 %v5784_v31  ;;  %9216 = vmatprep.mubr.f32.mxu0 %v10181_v44 }
 0x387   : > { %v6761_v37 = vpop.f32.mrb[12].mxu1 }
 0x388   : > { %v6766_v39 = vand.u32 4294901760, %v6761_v37  ;;  %9217 = vmatmul.mubr.f32.vlgmr.msra.gmra.mrb[10].mxu0 %v10198_v51  ;;  %v9260_v42 = vpop.f32.mrb[13].mxu1 }
 0x389   : > { %9263 = vmatprep.mubr.f32.mxu0 %v10191_v48 }
 0x38a   : > { %v6853_v43 = vsub.f32 %v6761_v37, %v6766_v39  ;;  %9261 = vmatprep.subr.mxu0 %v6766_v39 }
 0x38b   : > { %9262 = vmatpush3.msra.mxu0 %v6766_v39 }
 0x38c   : > { %9264 = vmatmul.mubr.f32.vlgmr.msra.gmra.mrb[12].mxu0 %v10208_v60  ;;  %v6854_v47 = vand.u32 4294901760, %v6853_v43 }
 0x38d   : > { %9268 = vmatprep.mubr.f32.mxu0 %v10181_v44 }
 0x38e   : > { %v6855_v49 = vsub.f32 %v6853_v43, %v6854_v47 }
 0x390   : > { %v6856_v50 = vand.u32 4294901760, %v6855_v49 }
 0x392   : > { %9266 = vmatprep.subr.mxu0 %v6856_v50 }
 0x393   : > { %9267 = vmatpush3.msra.mxu0 %v6856_v50 }
 0x394   : > { %9269 = vmatmul.mubr.f32.vlgmr.msra.gmra.mrb[12].mxu0 %v10198_v51  ;;  %9271 = vmatprep.subr.mxu0 %v6853_v43 }
 0x395   : > { %9272 = vmatpush3.msra.mxu0 %v6853_v43  ;;  %9273 = vmatprep.mubr.f32.mxu0 %v10184_v45 }
 0x396   : > { %9276 = vmatprep.subr.mxu0 %v6766_v39 }
 0x39c   : > { %9274 = vmatmul.mubr.f32.vlgmr.msra.gmra.mrb[12].mxu0 %v10201_v52 }
 0x39d   : > { %9277 = vmatpush3.msra.mxu0 %v6766_v39  ;;  %9278 = vmatprep.mubr.f32.mxu0 %v10187_v46 }
 0x39e   : > { %9281 = vmatprep.subr.mxu0 %v6854_v47 }
 0x3a4   : > { %9279 = vmatmul.mubr.f32.vlgmr.msra.gmra.mrb[12].mxu0 %v10204_v53 }
 0x3a5   : > { %9282 = vmatpush3.msra.mxu0 %v6854_v47  ;;  %9283 = vmatprep.mubr.f32.mxu0 %v10181_v44 }
 0x3a6   : > { %9286 = vmatprep.subr.mxu0 %v6766_v39 }
 0x3ab   : > { %v8930_v12 = vpop.f32.mrb[2].mxu0 }
 0x3ac   : > { %v2349_v55 = vmax.f32 %v8930_v12, %v2347_v10  ;;  %v2334_v56 = vpop.f32.mrb[3].mxu0  ;;  %9284 = vmatmul.mubr.f32.vlgmr.msra.gmra.mrb[12].mxu0 %v10198_v51  ;;  %v7257_v10 = vsel %vm10369_vm12, -1.0, %v7255_v54 }
 0x3ad   : > { %v2348_v57 = vmax.f32 %v2334_v56, %v2346_v11  ;;  %9287 = vmatpush3.msra.mxu0 %v6766_v39  ;;  %9288 = vmatprep.mubr.f32.mxu0 %v10181_v44  ;;  %v7256_v11 = vsel %vm10374_vm13, -1.0, %v7255_v54 }
 0x3ae   : > { %v8436_v58 = vclamps-f32 %v2349_v55, 0.9 }
 0x3af   : > { %v8435_v59 = vclamps-f32 %v2348_v57, 0.9 }
 0x3b0   : > { %9792 = vtanh.f32 %v8436_v58 }
 0x3b1   : > { %9794 = vtanh.f32 %v8435_v59 }
 0x3b4   : > { %v7743_v61 = vpop.f32.mrb[14].mxu1  ;;  %9289 = vmatmul.mubr.f32.vlgmr.msra.gmra.mrb[12].mxu0 %v10198_v51 }
 0x3b5   : > { %v7748_v62 = vand.u32 4294901760, %v7743_v61  ;;  %v9332_v63 = vpop.f32.mrb[15].mxu1  ;;  %9335 = vmatprep.mubr.f32.mxu0 %v10191_v48  ;;  %v3327_v48 = vstv %s8443_s20 }
 0x3b6   : > { %v8237_v63 = vstv %s8488_s1 }
 0x3b7   : > { %v7835_v0 = vsub.f32 %v7743_v61, %v7748_v62  ;;  %9333 = vmatprep.subr.mxu0 %v7748_v62 }
 0x3b8   : > { %9334 = vmatpush3.msra.mxu0 %v7748_v62 }
 0x3b9   : > { %9336 = vmatmul.mubr.f32.vlgmr.msra.gmra.mrb[14].mxu0 %v10208_v60  ;;  %v7836_v1 = vand.u32 4294901760, %v7835_v0  ;;  %v3329_v60 = vsel %vm10369_vm12, -1.0, %v3327_v48 }
 0x3ba   : > { %v9793_v2 = vpop.eup %9792  ;;  %9340 = vmatprep.mubr.f32.mxu0 %v10181_v44 }
 0x3bb   : > { %v9795_v3 = vpop.eup %9794  ;;  %8438 = vst.msk [vmem:[%s10401_s15 + $0x18] sm:$0xff] %vm1374_vm14, %v9793_v2  ;;  %v7837_v4 = vsub.f32 %v7835_v0, %v7836_v1 }
 0x3bc   : > { %8437 = vst.msk [vmem:[%s10401_s15 + $0x10] sm:$0xff] %vm1374_vm14, %v9795_v3 }
 0x3bd   : > { %v7838_v6 = vand.u32 4294901760, %v7837_v4 }
 0x3bf   : > { %9338 = vmatprep.subr.mxu0 %v7838_v6 }
 0x3c0   : > { %9339 = vmatpush3.msra.mxu0 %v7838_v6 }
 0x3c1   : > { %9341 = vmatmul.mubr.f32.vlgmr.msra.gmra.mrb[14].mxu0 %v10198_v51  ;;  %9343 = vmatprep.subr.mxu0 %v7835_v0 }
 0x3c2   : > { %9344 = vmatpush3.msra.mxu0 %v7835_v0  ;;  %9345 = vmatprep.mubr.f32.mxu0 %v10184_v45  ;;  %v3328_v45 = vsel %vm10374_vm13, -1.0, %v3327_v48  ;;  %v8239_v0 = vsel %vm10369_vm12, -1.0, %v8237_v63 }
 0x3c3   : > { %9348 = vmatprep.subr.mxu0 %v7748_v62 }
 0x3c9   : > { %9346 = vmatmul.mubr.f32.vlgmr.msra.gmra.mrb[14].mxu0 %v10201_v52 }
 0x3ca   : > { %9349 = vmatpush3.msra.mxu0 %v7748_v62  ;;  %9350 = vmatprep.mubr.f32.mxu0 %v10187_v46 }
 0x3cb   : > { %9353 = vmatprep.subr.mxu0 %v7836_v1 }
 0x3d1   : > { %9351 = vmatmul.mubr.f32.vlgmr.msra.gmra.mrb[14].mxu0 %v10204_v53 }
 0x3d2   : > { %9354 = vmatpush3.msra.mxu0 %v7836_v1  ;;  %9355 = vmatprep.mubr.f32.mxu0 %v10181_v44  ;;  %v8238_v1 = vsel %vm10374_vm13, -1.0, %v8237_v63 }
 0x3d3   : > { %9358 = vmatprep.subr.mxu0 %v7748_v62 }
 0x3d7   : > { %v9002_v52 = vpop.f32.mrb[4].mxu0 }
 0x3d8   : > { %v3331_v7 = vmax.f32 %v9002_v52, %v3329_v60  ;;  %v3316_v46 = vpop.f32.mrb[5].mxu0 }
 0x3d9   : > { %v3330_v38 = vmax.f32 %v3316_v46, %v3328_v45  ;;  %9356 = vmatmul.mubr.f32.vlgmr.msra.gmra.mrb[14].mxu0 %v10198_v51 }
 0x3da   : > { %v8445_v53 = vclamps-f32 %v3331_v7, 0.9  ;;  %9359 = vmatpush3.msra.mxu0 %v7748_v62  ;;  %9360 = vmatprep.mubr.f32.mxu0 %v10181_v44  ;;  %v4310_v44 = vsel %vm10374_vm13, -1.0, %v4309_v5 }
 0x3db   : > { %v8444_v40 = vclamps-f32 %v3330_v38, 0.9 }
 0x3dc   : > { %9796 = vtanh.f32 %v8445_v53 }
 0x3dd   : > { %9798 = vtanh.f32 %v8444_v40 }
 0x3e1   : > { %9361 = vmatmul.mubr.f32.vlgmr.msra.gmra.mrb[14].mxu0 %v10198_v51 }
 0x3e6   : > { %v9797_v13 = vpop.eup %9796 }
 0x3e7   : > { %v9799_v14 = vpop.eup %9798  ;;  %8447 = vst.msk [vmem:[%s10401_s15 + $0x28] sm:$0xff] %vm1374_vm14, %v9797_v13 }
 0x3e8   : > { %8446 = vst.msk [vmem:[%s10401_s15 + $0x20] sm:$0xff] %vm1374_vm14, %v9799_v14 }
 0x403   : > { %v9074_v15 = vpop.f32.mrb[6].mxu0 }
 0x404   : > { %v4313_v8 = vmax.f32 %v9074_v15, %v4311_v41  ;;  %v4298_v9 = vpop.f32.mrb[7].mxu0 }
 0x405   : > { %v4312_v51 = vmax.f32 %v4298_v9, %v4310_v44 }
 0x406   : > { %v8454_v16 = vclamps-f32 %v4313_v8, 0.9 }
 0x407   : > { %v8453_v17 = vclamps-f32 %v4312_v51, 0.9 }
 0x408   : > { %9800 = vtanh.f32 %v8454_v16 }
 0x409   : > { %9802 = vtanh.f32 %v8453_v17 }
 0x412   : > { %v9801_v18 = vpop.eup %9800 }
 0x413   : > { %v9803_v19 = vpop.eup %9802  ;;  %8456 = vst.msk [vmem:[%s10401_s15 + $0x38] sm:$0xff] %vm1374_vm14, %v9801_v18 }
 0x414   : > { %8455 = vst.msk [vmem:[%s10401_s15 + $0x30] sm:$0xff] %vm1374_vm14, %v9803_v19 }
 0x42f   : > { %v9146_v25 = vpop.f32.mrb[8].mxu0 }
 0x430   : > { %v5295_v26 = vmax.f32 %v9146_v25, %v5293_v22  ;;  %v5280_v27 = vpop.f32.mrb[9].mxu0 }
 0x431   : > { %v5294_v28 = vmax.f32 %v5280_v27, %v5292_v24 }
 0x432   : > { %v8463_v29 = vclamps-f32 %v5295_v26, 0.9 }
 0x433   : > { %v8462_v30 = vclamps-f32 %v5294_v28, 0.9 }
 0x434   : > { %9804 = vtanh.f32 %v8463_v29 }
 0x435   : > { %9806 = vtanh.f32 %v8462_v30 }
 0x43e   : > { %v9805_v31 = vpop.eup %9804 }
 0x43f   : > { %v9807_v32 = vpop.eup %9806  ;;  %8465 = vst.msk [vmem:[%s10401_s15 + $0x48] sm:$0xff] %vm1374_vm14, %v9805_v31 }
 0x440   : > { %8464 = vst.msk [vmem:[%s10401_s15 + $0x40] sm:$0xff] %vm1374_vm14, %v9807_v32 }
 0x45b   : > { %v9218_v36 = vpop.f32.mrb[10].mxu0 }
 0x45c   : > { %v6277_v37 = vmax.f32 %v9218_v36, %v6275_v34  ;;  %v6262_v39 = vpop.f32.mrb[11].mxu0 }
 0x45d   : > { %v6276_v42 = vmax.f32 %v6262_v39, %v6274_v35 }
 0x45e   : > { %v8472_v43 = vclamps-f32 %v6277_v37, 0.9 }
 0x45f   : > { %v8471_v47 = vclamps-f32 %v6276_v42, 0.9 }
 0x460   : > { %9808 = vtanh.f32 %v8472_v43 }
 0x461   : > { %9810 = vtanh.f32 %v8471_v47 }
 0x46a   : > { %v9809_v49 = vpop.eup %9808 }
 0x46b   : > { %v9811_v50 = vpop.eup %9810  ;;  %8474 = vst.msk [vmem:[%s10401_s15 + $0x58] sm:$0xff] %vm1374_vm14, %v9809_v49 }
 0x46c   : > { %8473 = vst.msk [vmem:[%s10401_s15 + $0x50] sm:$0xff] %vm1374_vm14, %v9811_v50 }
 0x487   : > { %v9290_v12 = vpop.f32.mrb[12].mxu0 }
 0x488   : > { %v7259_v55 = vmax.f32 %v9290_v12, %v7257_v10  ;;  %v7244_v56 = vpop.f32.mrb[13].mxu0 }
 0x489   : > { %v7258_v57 = vmax.f32 %v7244_v56, %v7256_v11 }
 0x48a   : > { %v8481_v58 = vclamps-f32 %v7259_v55, 0.9 }
 0x48b   : > { %v8480_v59 = vclamps-f32 %v7258_v57, 0.9 }
 0x48c   : > { %9812 = vtanh.f32 %v8481_v58 }
 0x48d   : > { %9814 = vtanh.f32 %v8480_v59 }
 0x496   : > { %v9813_v61 = vpop.eup %9812 }
 0x497   : > { %v9815_v62 = vpop.eup %9814  ;;  %8483 = vst.msk [vmem:[%s10401_s15 + $0x68] sm:$0xff] %vm1374_vm14, %v9813_v61 }
 0x498   : > { %8482 = vst.msk [vmem:[%s10401_s15 + $0x60] sm:$0xff] %vm1374_vm14, %v9815_v62 }
 0x4b4   : > { %v9362_v2 = vpop.f32.mrb[14].mxu0 }
 0x4b5   : > { %v8241_v3 = vmax.f32 %v9362_v2, %v8239_v0  ;;  %v8226_v4 = vpop.f32.mrb[15].mxu0 }
 0x4b6   : > { %v8240_v6 = vmax.f32 %v8226_v4, %v8238_v1 }
 0x4b7   : > { %v8490_v48 = vclamps-f32 %v8241_v3, 0.9 }
 0x4b8   : > { %v8489_v60 = vclamps-f32 %v8240_v6, 0.9 }
 0x4b9   : > { %9816 = vtanh.f32 %v8490_v48 }
 0x4ba   : > { %9818 = vtanh.f32 %v8489_v60 }
 0x4c3   : > { %v9817_v45 = vpop.eup %9816 }
 0x4c4   : > { %v9819_v52 = vpop.eup %9818  ;;  %8492 = vst.msk [vmem:[%s10401_s15 + $0x78] sm:$0xff] %vm1374_vm14, %v9817_v45 }
 0x4c5   : > { %8491 = vst.msk [vmem:[%s10401_s15 + $0x70] sm:$0xff] %vm1374_vm14, %v9819_v52 }
 0x4c6   : > { %s8494_s7 = sshll.u32 %s9923_s24, 1  ;;  %s8495_s9 = sshll.u32 %s9927_s25, 5 }
 0x4c7   : > { %s8264_s14 = sadd.s32 %s8495_s9, %s8494_s7  ;;  %s8283_s17 = sshll.u32 %s10401_s15, 4  ;;  %s8284_s17 = int_to_ptr.vmem [resolvable:$true] %s8283_s17 }
 0x4c8   : > { %s8496_s19 = sshll.u32 %s8264_s14, 7  ;;  %s9947_s29 = smov 256  }
 0x4c9   : > { %s8266_s11 = scalar_lea.hbm %s10650_s6, %s8496_s19  ;;  %p10674_p2 = scmp.ne.s32.totalorder %s10661_s12, 0 }
 0x4ca   : > { %s9948_s8 = smov 512   ;;  %s9949_s10 = smov 2  }
 0x4cb   : > { %9682 = sst [smem:[#allocation11]] (%p10674_p2), %s9947_s29  ;;  %s9950_s24 = smov 128  }
 0x4cc   : > { %9683 = sst [smem:[#allocation11 + $0x1]] (%p10674_p2), %s9948_s8  ;;  %s9951_s25 = smov 8  }
 0x4cd   : > { %9684 = sst [smem:[#allocation11 + $0x2]] (%p10674_p2), %s9949_s10  ;;  %s9952_s15 = smov [#allocation10]  }
 0x4ce   : > { %9685 = sst [smem:[#allocation11 + $0x3]] (%p10674_p2), %s9950_s24  ;;  %s9953_s1 = smov 0  }
 0x4cf   : > { %9686 = sst [smem:[#allocation11 + $0x4]] (%p10674_p2), %s9950_s24 }
 0x4d0   : > { %9687 = sst [smem:[#allocation11 + $0x5]] (%p10674_p2), %s9951_s25 }
 0x4d1   : > { %9688 = dma.general (%p10674_p2), %s8284_s17, 2048, %s8266_s11, %s8252_s16, %s9952_s15, [#allocation11], %s9953_s1, 0  }
 0x4d2 PF: > { %p9710_p5 = scmp.ge.s32.totalorder %s9939_s28, 2  ;;  %s8311_s7 = sand.u32 1, %s9911_s21  }
 0x4d3   : > { %p10675_p7 = scmp.ne.s32.totalorder %s10662_s13, 0  ;;  %s8312_s9 = scalar_lea.sflag [#allocation3], %s8311_s7 }
 0x4d5   : > { %p9701_p10 = pnand %p9710_p5, %p10675_p7 }
 0x4d7   : > { %9906 = dma.done.wait (!%p9701_p10), %s8312_s9, 2048  }
 0x4d8   : > { %9908 = vsyncadd (!%p9701_p10), %s8312_s9, 4294965248  ;;  %s21_s28 = sadd.s32 1, %s9939_s28   ;;  %s10676_s12 = sld [smem:[#allocation15_spill]] }
 0x4d9   : > { %p18_p11 = scmp.ge.s32.totalorder %s21_s28, 6   ;;  %s10677_s16 = sld [smem:[#allocation16_spill]] }
 0x4da   : > { %s10678_s21 = smov %s9915_s22  ;;  %s10679_s22 = smov %s9919_s23 }
 0x4db   : > { %s10680_s23 = smov %s10071_s18  ;;  %s10681_s24 = smov %s9931_s26 }
 0x4dc   : > { %s10682_s25 = smov %s9935_s27  ;;  %20 = sbr.rel (!%p18_p11) target bundleno = 9 (0x9), region = 149 }
 0x4de   : > { %s10683_s26 = smov %s10676_s12 }
 0x4df   : > { %s10684_s27 = smov %s10677_s16 }
 0x4e3   :  { %8317 = vsyncpa [#allocation3], 1 }
 0x4e4   :  { %8319 = vsyncpa [#allocation3 + $0x1], 1 }
 0x4e5   :  { %8320 = vsyncpa [#allocation4], 1 }
 0x4e6   :  { %8322 = vsyncpa [#allocation4 + $0x1], 1 }
 0x4e7   :  { %8323 = vsyncpa [#allocation6], 1 }

</bundles_post_ra>
